<compile_context>
chip_gen: v6e
topology: v6e:2x2x1
jax: 0.10.0
libtpu: 0.0.40
codegen_flags: <defaults>
</compile_context>

<pallas_src>
import math

import jax
import jax.numpy as jnp
from jax import lax
from jax.experimental import pallas as pl
from jax.experimental.pallas import tpu as pltpu


def _layer_norm(x, w, b, eps=1e-5):
    mu = jnp.mean(x, axis=-1, keepdims=True)
    xc = x - mu
    var = jnp.mean(xc * xc, axis=-1, keepdims=True)
    return xc * lax.rsqrt(var + eps) * w + b


def _pick_tile(n, target, quantum):
    """Largest divisor of n that is <= target and a multiple of `quantum`; falls back to n."""
    for t in range(min(n, target), 0, -1):
        if n % t == 0 and t % quantum == 0:
            return t
    return n


def transformer_block(x, params, num_heads, *,
                      compute_dtype=jnp.bfloat16,   # bf16 MXU operands on v5e/v6e/v7x (accum f32)
                      q_tile=256,                   # 256-row LHS tiles fill the v6e/v7x 256x256 MXU
                      ffn_chunk=1024,               # FFN hidden chunk, only used when not resident
                      ffn_resident=None,            # None = auto-decide from the VMEM budget
                      interpret=False):
    B, S, E = x.shape
    F = params['w1'].shape[0]
    H = num_heads
    assert E % H == 0, "embed dim must be divisible by num_heads"
    Dh = E // H
    scale = 1.0 / math.sqrt(Dh)
    f32 = jnp.float32
    cdt = compute_dtype

    TQ = _pick_tile(S, q_tile, 8)       # divides S, multiple of 8 (or == S)
    nq = S // TQ

    # ---- VMEM capacity probe + FFN-weight residency decision ----------------------------------
    try:
        vmem_cap = int(pltpu.get_tpu_info().vmem_capacity_bytes)
    except Exception:
        vmem_cap = 64 * 1024 * 1024     # v7x-sized conservative fallback
    ws = jnp.dtype(cdt).itemsize
    xb = jnp.dtype(x.dtype).itemsize
    f32b = 4
    inv_w = 4 * E * E * ws                              # Wq/Wk/Wv/Wo (grid-invariant)
    inv_vec = (4 * E + 4 * E + E) * f32b                # qkv/o biases + LN params + b2
    x_blk = S * E * xb                                  # x block (full sequence, per batch)
    out_blk = TQ * E * xb
    scratch_bytes = 2 * S * E * ws + TQ * E * ws + 2 * TQ * E * f32b
    temps_full = (TQ * E + 2 * S * E + 2 * TQ * S + TQ * F + 2 * TQ * E) * f32b
    base = 2 * (inv_w + inv_vec + x_blk + out_blk) + scratch_bytes + temps_full
    if ffn_resident is None:
        ffn_resident = base + 2 * (2 * E * F * ws + F * f32b) <= int(vmem_cap * 0.7)
    FC = F if ffn_resident else _pick_tile(F, ffn_chunk, 128)
    nf = F // FC

    # ---- tight VMEM limit: double-buffered pipeline blocks, resident scratch, ONE live score
    #      matrix (the head loop keeps at most one (TQ, S) score + exp live at a time) ----------
    ffn_blk = (2 * E * FC) * ws + FC * f32b
    temps = (TQ * E + 2 * S * E + 2 * TQ * S + TQ * FC + 2 * TQ * E) * f32b
    est = 2 * (inv_w + inv_vec + ffn_blk + x_blk + out_blk) + scratch_bytes + temps
    vmem_limit = min(int(vmem_cap * 0.9), max(32 << 20, int(est * 3 // 2) + (8 << 20)))

    # ---- host-side weight prep: split QKV slab, transpose for row-major dots ------------------
    w_in, b_in = params['w_in'], params['b_in']        # (3E, E), (3E,)
    wq_t = w_in[:E].T.astype(cdt)                      # (E, E)
    wk_t = w_in[E:2 * E].T.astype(cdt)
    wv_t = w_in[2 * E:].T.astype(cdt)
    bq = b_in[:E].reshape(1, E).astype(f32)
    bk = b_in[E:2 * E].reshape(1, E).astype(f32)
    bv = b_in[2 * E:].reshape(1, E).astype(f32)
    wo_t = params['w_out'].T.astype(cdt)               # (E, E)
    bo = params['b_out'].reshape(1, E).astype(f32)
    w1_t = params['w1'].T.astype(cdt)                  # (E, F)
    b1 = params['b1'].reshape(1, F).astype(f32)
    w2_t = params['w2'].T.astype(cdt)                  # (F, E)
    b2 = params['b2'].reshape(1, E).astype(f32)
    ln1_w = params['ln1_w'].reshape(1, E).astype(f32)
    ln1_b = params['ln1_b'].reshape(1, E).astype(f32)
    ln2_w = params['ln2_w'].reshape(1, E).astype(f32)
    ln2_b = params['ln2_b'].reshape(1, E).astype(f32)

    # ---- the kernel ----------------------------------------------------------------------------
    def kernel(x_ref,
               wq_ref, bq_ref, wk_ref, bk_ref, wv_ref, bv_ref,
               wo_ref, bo_ref, ln1_w_ref, ln1_b_ref,
               w1_ref, b1_ref, w2_ref, b2_ref, ln2_w_ref, ln2_b_ref,
               out_ref,
               k_scr, v_scr, ctx_scr, y_scr, acc_scr):
        qi = pl.program_id(1)
        fc = pl.program_id(2)
        nf_ = pl.num_programs(2)

        # -- K/V projections: ONCE per batch, cached in VMEM scratch for all q-tiles ------------
        @pl.when(jnp.logical_and(fc == 0, qi == 0))
        def _kv_proj():
            x_all = x_ref[0]                                            # (S, E)
            k = jnp.dot(x_all.astype(cdt), wk_ref[...],
                        preferred_element_type=jnp.float32) + bk_ref[...]
            v = jnp.dot(x_all.astype(cdt), wv_ref[...],
                        preferred_element_type=jnp.float32) + bv_ref[...]
            k_scr[...] = k.astype(k_scr.dtype)
            v_scr[...] = v.astype(v_scr.dtype)

        # -- attention + residual + LayerNorm1: once per (batch, q-tile), on the first FFN chunk --
        @pl.when(fc == 0)
        def _attn_and_ln1():
            row0 = qi * TQ
            if TQ % 8 == 0:
                row0 = pl.multiple_of(row0, 8)
            x_q = x_ref[0, pl.ds(row0, TQ), :].astype(jnp.float32)      # (TQ, E) query-token tile
            q = jnp.dot(x_q.astype(cdt), wq_ref[...],
                        preferred_element_type=jnp.float32) + bq_ref[...]
            q = q * scale                                               # PyTorch scales q post-proj

            for h in range(H):                                          # per-head 2D dots
                c0, c1 = h * Dh, (h + 1) * Dh
                q_h = q[:, c0:c1].astype(cdt)                           # (TQ, Dh)
                s = lax.dot_general(q_h, k_scr[:, c0:c1], (((1,), (1,)), ((), ())),
                                    preferred_element_type=jnp.float32)  # (TQ, S)
                s = s - jnp.max(s, axis=-1, keepdims=True)
                p = jnp.exp(s)
                denom = jnp.sum(p, axis=-1, keepdims=True)              # (TQ, 1)
                ctx_h = jnp.dot(p.astype(cdt), v_scr[:, c0:c1],
                                preferred_element_type=jnp.float32)     # (TQ, Dh)
                # exact reciprocal, applied AFTER the PV matmul (TQ*Dh values, not TQ*S)
                ctx_scr[:, c0:c1] = (ctx_h * (1.0 / denom)).astype(ctx_scr.dtype)

            attn = jnp.dot(ctx_scr[...], wo_ref[...],
                           preferred_element_type=jnp.float32) + bo_ref[...]
            # residual + LayerNorm1 (dropout == identity in eval mode)
            y_scr[...] = _layer_norm(x_q + attn, ln1_w_ref[...], ln1_b_ref[...])
            acc_scr[...] = jnp.zeros_like(acc_scr)

        # -- FFN (streamed over F when nf > 1): acc += relu(y @ W1[:, c] + b1[c]) @ W2[c, :] -----
        y = y_scr[...]
        hid = jnp.dot(y.astype(cdt), w1_ref[...],
                      preferred_element_type=jnp.float32) + b1_ref[...]
        hid = jnp.maximum(hid, 0.0)
        acc_scr[...] += jnp.dot(hid.astype(cdt), w2_ref[...],
                                preferred_element_type=jnp.float32)

        # -- residual + LayerNorm2: on the last FFN chunk, write the output tile -----------------
        @pl.when(fc == nf_ - 1)
        def _ln2_and_store():
            ff = acc_scr[...] + b2_ref[...]
            out_ref[0] = _layer_norm(y_scr[...] + ff,
                                     ln2_w_ref[...], ln2_b_ref[...]).astype(out_ref.dtype)

    # ---- specs ---------------------------------------------------------------------------------
    def const2(shape):      # grid-invariant block: fetched once, never re-DMA'd by the pipeline
        return pl.BlockSpec(shape, lambda b, q, f: (0, 0))

    in_specs = [
        pl.BlockSpec((1, S, E), lambda b, q, f: (b, 0, 0)),    # x (full sequence; one DMA per batch)
        const2((E, E)), const2((1, E)),                        # Wq^T, bq
        const2((E, E)), const2((1, E)),                        # Wk^T, bk
        const2((E, E)), const2((1, E)),                        # Wv^T, bv
        const2((E, E)), const2((1, E)),                        # Wout^T, bout
        const2((1, E)), const2((1, E)),                        # LN1 gamma / beta
        pl.BlockSpec((E, FC), lambda b, q, f: (0, f)),         # W1^T chunk (constant when nf == 1)
        pl.BlockSpec((1, FC), lambda b, q, f: (0, f)),         # b1 chunk
        pl.BlockSpec((FC, E), lambda b, q, f: (f, 0)),         # W2^T chunk
        const2((1, E)),                                        # b2
        const2((1, E)), const2((1, E)),                        # LN2 gamma / beta
    ]
    out_spec = pl.BlockSpec((1, TQ, E), lambda b, q, f: (b, q, 0))
    scratch_shapes = [
        pltpu.VMEM((S, E), cdt),            # K cache (computed once per batch)
        pltpu.VMEM((S, E), cdt),            # V cache (computed once per batch)
        pltpu.VMEM((TQ, E), cdt),           # per-head context slab (lane-dense Wo operand)
        pltpu.VMEM((TQ, E), jnp.float32),   # y = LN1(x + attn), reused across FFN chunks
        pltpu.VMEM((TQ, E), jnp.float32),   # FFN accumulator
    ]

    return pl.pallas_call(
        kernel,
        out_shape=jax.ShapeDtypeStruct((B, S, E), x.dtype),
        grid=(B, nq, nf),
        in_specs=in_specs,
        out_specs=out_spec,
        scratch_shapes=scratch_shapes,
        compiler_params=pltpu.CompilerParams(
            # batch is megacore-parallel; q stays sequential per core because K/V are cached per
            # batch in scratch (computed at q == 0); f is the FFN reduction axis.
            dimension_semantics=("parallel", "arbitrary", "arbitrary"),
            vmem_limit_bytes=vmem_limit),
        interpret=interpret,
    )(x, wq_t, bq, wk_t, bk, wv_t, bv, wo_t, bo, ln1_w, ln1_b,
      w1_t, b1, w2_t, b2, ln2_w, ln2_b)


def transformer_block_ref(x, params, num_heads):
    """Pure-JAX reference reproducing PyTorch nn.MultiheadAttention (eval mode) semantics."""
    B, S, E = x.shape
    H = num_heads
    Dh = E // H
    qkv = x @ params['w_in'].T + params['b_in']
    q, k, v = qkv[..., :E], qkv[..., E:2 * E], qkv[..., 2 * E:]
    q = q.reshape(B, S, H, Dh) / math.sqrt(Dh)
    k = k.reshape(B, S, H, Dh)
    v = v.reshape(B, S, H, Dh)
    scores = jnp.einsum('bqhd,bkhd->bhqk', q, k)
    p = jax.nn.softmax(scores, axis=-1)
    ctx = jnp.einsum('bhqk,bkhd->bqhd', p, v).reshape(B, S, E)
    attn_out = ctx @ params['w_out'].T + params['b_out']

    def ln(z, w, b, eps=1e-5):
        mu = jnp.mean(z, axis=-1, keepdims=True)
        var = jnp.mean((z - mu) ** 2, axis=-1, keepdims=True)
        return (z - mu) / jnp.sqrt(var + eps) * w + b

    y = ln(x + attn_out, params['ln1_w'], params['ln1_b'])
    h = jnp.maximum(y @ params['w1'].T + params['b1'], 0.0)
    ff = h @ params['w2'].T + params['b2']
    return ln(y + ff, params['ln2_w'], params['ln2_b'])


def init_params(key, embed, hidden):
    ks = jax.random.split(key, 8)
    s = 0.05
    return {
        'w_in':  jax.random.normal(ks[0], (3 * embed, embed), jnp.float32) * s,
        'b_in':  jax.random.normal(ks[1], (3 * embed,), jnp.float32) * s,
        'w_out': jax.random.normal(ks[2], (embed, embed), jnp.float32) * s,
        'b_out': jax.random.normal(ks[3], (embed,), jnp.float32) * s,
        'ln1_w': jnp.ones((embed,), jnp.float32),
        'ln1_b': jnp.zeros((embed,), jnp.float32),
        'w1':    jax.random.normal(ks[4], (hidden, embed), jnp.float32) * s,
        'b1':    jax.random.normal(ks[5], (hidden,), jnp.float32) * s,
        'w2':    jax.random.normal(ks[6], (embed, hidden), jnp.float32) * s,
        'b2':    jax.random.normal(ks[7], (embed,), jnp.float32) * s,
        'ln2_w': jnp.ones((embed,), jnp.float32),
        'ln2_b': jnp.zeros((embed,), jnp.float32),
    }


if __name__ == "__main__":
    B, S, E, H, F = 2, 8, 32, 4, 256     # batch, seq, embed, heads, ffn hidden
    key = jax.random.PRNGKey(0)
    kx, kp = jax.random.split(key)
    x = jax.random.normal(kx, (B, S, E), jnp.float32)
    params = init_params(kp, E, F)

    ref = transformer_block_ref(x, params, H)

    # f32 matmul path; auto-resident FFN weights (nf == 1 at these shapes).
    out = transformer_block(x, params, H, compute_dtype=jnp.float32)
    out = jax.block_until_ready(out)
    assert out.shape == (B, S, E)
    assert jnp.allclose(out, ref, atol=5e-3, rtol=5e-3), "f32 kernel mismatch vs reference"

    # f32, forced streamed-FFN path (exercises the nf > 1 reduction axis + accumulator).
    out_s = transformer_block(x, params, H, compute_dtype=jnp.float32,
                              ffn_resident=False, ffn_chunk=128)
    out_s = jax.block_until_ready(out_s)
    assert jnp.allclose(out_s, ref, atol=5e-3, rtol=5e-3), "streamed-FFN kernel mismatch"

    # default bf16 matmul-operand path (MXU-native on v5e/v6e/v7x); accum/softmax/LN stay f32.
    out_bf16 = transformer_block(x, params, H)
    out_bf16 = jax.block_until_ready(out_bf16)
    assert jnp.allclose(out_bf16, ref, atol=5e-2, rtol=5e-2), "bf16 kernel mismatch vs reference"

    print("KERNEL_OK")
</pallas_src>

<mosaic_0001>
module attributes {stable_mosaic.version = 11 : i64} {
  func.func @kernel(%arg0: i32, %arg1: i32, %arg2: i32, %arg3: memref<1x8x32xf32, #tpu.memory_space<vmem>>, %arg4: memref<32x32xf32, #tpu.memory_space<vmem>>, %arg5: memref<1x32xf32, #tpu.memory_space<vmem>>, %arg6: memref<32x32xf32, #tpu.memory_space<vmem>>, %arg7: memref<1x32xf32, #tpu.memory_space<vmem>>, %arg8: memref<32x32xf32, #tpu.memory_space<vmem>>, %arg9: memref<1x32xf32, #tpu.memory_space<vmem>>, %arg10: memref<32x32xf32, #tpu.memory_space<vmem>>, %arg11: memref<1x32xf32, #tpu.memory_space<vmem>>, %arg12: memref<1x32xf32, #tpu.memory_space<vmem>>, %arg13: memref<1x32xf32, #tpu.memory_space<vmem>>, %arg14: memref<32x256xf32, #tpu.memory_space<vmem>>, %arg15: memref<1x256xf32, #tpu.memory_space<vmem>>, %arg16: memref<256x32xf32, #tpu.memory_space<vmem>>, %arg17: memref<1x32xf32, #tpu.memory_space<vmem>>, %arg18: memref<1x32xf32, #tpu.memory_space<vmem>>, %arg19: memref<1x32xf32, #tpu.memory_space<vmem>>, %arg20: memref<1x8x32xf32, #tpu.memory_space<vmem>>, %arg21: memref<8x32xf32, #tpu.memory_space<vmem>>, %arg22: memref<8x32xf32, #tpu.memory_space<vmem>>, %arg23: memref<8x32xf32, #tpu.memory_space<vmem>>, %arg24: memref<8x32xf32, #tpu.memory_space<vmem>>, %arg25: memref<8x32xf32, #tpu.memory_space<vmem>>) attributes {dimension_semantics = [#tpu.dimension_semantics<parallel>, #tpu.dimension_semantics<arbitrary>, #tpu.dimension_semantics<arbitrary>], iteration_bounds = array<i64: 2, 1, 1>, scalar_prefetch = 0 : i64, scratch_operands = 5 : i64, tpu.core_type = #tpu.core_type<tc>, window_params = [{transform_indices = @transform_0, window_bounds = array<i64: 1, 8, 32>}, {pipeline_mode = #tpu.pipeline_mode<synchronous>, transform_indices = @transform_1, window_bounds = array<i64: 32, 32>}, {pipeline_mode = #tpu.pipeline_mode<synchronous>, transform_indices = @transform_2, window_bounds = array<i64: 1, 32>}, {pipeline_mode = #tpu.pipeline_mode<synchronous>, transform_indices = @transform_3, window_bounds = array<i64: 32, 32>}, {pipeline_mode = #tpu.pipeline_mode<synchronous>, transform_indices = @transform_4, window_bounds = array<i64: 1, 32>}, {pipeline_mode = #tpu.pipeline_mode<synchronous>, transform_indices = @transform_5, window_bounds = array<i64: 32, 32>}, {pipeline_mode = #tpu.pipeline_mode<synchronous>, transform_indices = @transform_6, window_bounds = array<i64: 1, 32>}, {pipeline_mode = #tpu.pipeline_mode<synchronous>, transform_indices = @transform_7, window_bounds = array<i64: 32, 32>}, {pipeline_mode = #tpu.pipeline_mode<synchronous>, transform_indices = @transform_8, window_bounds = array<i64: 1, 32>}, {pipeline_mode = #tpu.pipeline_mode<synchronous>, transform_indices = @transform_9, window_bounds = array<i64: 1, 32>}, {pipeline_mode = #tpu.pipeline_mode<synchronous>, transform_indices = @transform_10, window_bounds = array<i64: 1, 32>}, {transform_indices = @transform_11, window_bounds = array<i64: 32, 256>}, {transform_indices = @transform_12, window_bounds = array<i64: 1, 256>}, {transform_indices = @transform_13, window_bounds = array<i64: 256, 32>}, {pipeline_mode = #tpu.pipeline_mode<synchronous>, transform_indices = @transform_14, window_bounds = array<i64: 1, 32>}, {pipeline_mode = #tpu.pipeline_mode<synchronous>, transform_indices = @transform_15, window_bounds = array<i64: 1, 32>}, {pipeline_mode = #tpu.pipeline_mode<synchronous>, transform_indices = @transform_16, window_bounds = array<i64: 1, 32>}, {transform_indices = @transform_17, window_bounds = array<i64: 1, 8, 32>}]} {
    %c0_i32 = arith.constant 0 : i32
    %0 = arith.cmpi eq, %arg2, %c0_i32 : i32
    %c0_i32_0 = arith.constant 0 : i32
    %1 = arith.cmpi eq, %arg1, %c0_i32_0 : i32
    %2 = arith.andi %0, %1 : i1
    %3 = arith.extui %2 : i1 to i32
    %c0_i32_1 = arith.constant 0 : i32
    %4 = arith.cmpi ne, %3, %c0_i32_1 : i32
    scf.if %4 {
      %c0_19 = arith.constant 0 : index
      %c0_20 = arith.constant 0 : index
      %c0_21 = arith.constant 0 : index
      %24 = vector.load %arg3[%c0_19, %c0_20, %c0_21] : memref<1x8x32xf32, #tpu.memory_space<vmem>>, vector<1x8x32xf32>
      %25 = vector.shape_cast %24 : vector<1x8x32xf32> to vector<8x32xf32>
      %c0_22 = arith.constant 0 : index
      %c0_23 = arith.constant 0 : index
      %26 = vector.load %arg6[%c0_22, %c0_23] : memref<32x32xf32, #tpu.memory_space<vmem>>, vector<32x32xf32>
      %cst_24 = arith.constant dense<0.000000e+00> : vector<8x32xf32>
      %27 = tpu.matmul %25, %26, %cst_24 {dimension_numbers = #tpu.dot_dimension_numbers<[1], [0], [0], [1], [0, 0, 1, 1], [], []>} : vector<8x32xf32>, vector<32x32xf32>, vector<8x32xf32> -> vector<8x32xf32>
      %c0_25 = arith.constant 0 : index
      %c0_26 = arith.constant 0 : index
      %28 = vector.load %arg7[%c0_25, %c0_26] : memref<1x32xf32, #tpu.memory_space<vmem>>, vector<1x32xf32>
      %29 = vector.broadcast %28 : vector<1x32xf32> to vector<8x32xf32>
      %30 = arith.addf %27, %29 : vector<8x32xf32>
      %c0_27 = arith.constant 0 : index
      %c0_28 = arith.constant 0 : index
      %31 = vector.load %arg8[%c0_27, %c0_28] : memref<32x32xf32, #tpu.memory_space<vmem>>, vector<32x32xf32>
      %cst_29 = arith.constant dense<0.000000e+00> : vector<8x32xf32>
      %32 = tpu.matmul %25, %31, %cst_29 {dimension_numbers = #tpu.dot_dimension_numbers<[1], [0], [0], [1], [0, 0, 1, 1], [], []>} : vector<8x32xf32>, vector<32x32xf32>, vector<8x32xf32> -> vector<8x32xf32>
      %c0_30 = arith.constant 0 : index
      %c0_31 = arith.constant 0 : index
      %33 = vector.load %arg9[%c0_30, %c0_31] : memref<1x32xf32, #tpu.memory_space<vmem>>, vector<1x32xf32>
      %34 = vector.broadcast %33 : vector<1x32xf32> to vector<8x32xf32>
      %35 = arith.addf %32, %34 : vector<8x32xf32>
      %c0_32 = arith.constant 0 : index
      %c0_33 = arith.constant 0 : index
      %36 = vector.load %arg21[%c0_32, %c0_33] : memref<8x32xf32, #tpu.memory_space<vmem>>, vector<8x32xf32>
      tpu.vector_store %arg21[%c0_32, %c0_33], %30 {strides = array<i32>} : memref<8x32xf32, #tpu.memory_space<vmem>>, vector<8x32xf32>,
      %c0_34 = arith.constant 0 : index
      %c0_35 = arith.constant 0 : index
      %37 = vector.load %arg22[%c0_34, %c0_35] : memref<8x32xf32, #tpu.memory_space<vmem>>, vector<8x32xf32>
      tpu.vector_store %arg22[%c0_34, %c0_35], %35 {strides = array<i32>} : memref<8x32xf32, #tpu.memory_space<vmem>>, vector<8x32xf32>,
    } else {
    }
    %c0_i32_2 = arith.constant 0 : i32
    %5 = arith.cmpi eq, %arg2, %c0_i32_2 : i32
    %6 = arith.extui %5 : i1 to i32
    %c0_i32_3 = arith.constant 0 : i32
    %7 = arith.cmpi ne, %6, %c0_i32_3 : i32
    scf.if %7 {
      %c8_i32 = arith.constant 8 : i32
      %24 = arith.muli %arg1, %c8_i32 : i32
      %25 = tpu.assume_multiple %24, 8 : i32
      %c0_19 = arith.constant 0 : index
      %26 = arith.index_cast %25 : i32 to index
      %c0_20 = arith.constant 0 : index
      %27 = vector.load %arg3[%c0_19, %26, %c0_20] : memref<1x8x32xf32, #tpu.memory_space<vmem>>, vector<1x8x32xf32>
      %28 = vector.shape_cast %27 : vector<1x8x32xf32> to vector<8x32xf32>
      %c0_21 = arith.constant 0 : index
      %c0_22 = arith.constant 0 : index
      %29 = vector.load %arg4[%c0_21, %c0_22] : memref<32x32xf32, #tpu.memory_space<vmem>>, vector<32x32xf32>
      %cst_23 = arith.constant dense<0.000000e+00> : vector<8x32xf32>
      %30 = tpu.matmul %28, %29, %cst_23 {dimension_numbers = #tpu.dot_dimension_numbers<[1], [0], [0], [1], [0, 0, 1, 1], [], []>} : vector<8x32xf32>, vector<32x32xf32>, vector<8x32xf32> -> vector<8x32xf32>
      %c0_24 = arith.constant 0 : index
      %c0_25 = arith.constant 0 : index
      %31 = vector.load %arg5[%c0_24, %c0_25] : memref<1x32xf32, #tpu.memory_space<vmem>>, vector<1x32xf32>
      %32 = vector.broadcast %31 : vector<1x32xf32> to vector<8x32xf32>
      %33 = arith.addf %30, %32 : vector<8x32xf32>
      %cst_26 = arith.constant 0.353553385 : f32
      %34 = vector.broadcast %cst_26 : f32 to vector<8x32xf32>
      %35 = arith.mulf %33, %34 : vector<8x32xf32>
      %36 = vector.extract_strided_slice %35 {offsets = [0, 0], sizes = [8, 8], strides = [1, 1]} : vector<8x32xf32> to vector<8x8xf32>
      %c0_27 = arith.constant 0 : index
      %c0_28 = arith.constant 0 : index
      %37 = vector.load %arg21[%c0_27, %c0_28] : memref<8x32xf32, #tpu.memory_space<vmem>>, vector<8x8xf32>
      %cst_29 = arith.constant dense<0.000000e+00> : vector<8x8xf32>
      %38 = tpu.matmul %36, %37, %cst_29 {dimension_numbers = #tpu.dot_dimension_numbers<[1], [1], [0], [0], [0, 0, 1, 0], [], []>} : vector<8x8xf32>, vector<8x8xf32>, vector<8x8xf32> -> vector<8x8xf32>
      %cst_30 = arith.constant dense<0xFF800000> : vector<8xf32>
      %39 = vector.multi_reduction <maximumf>, %38, %cst_30 [1] : vector<8x8xf32> to vector<8xf32>
      %40 = vector.shape_cast %39 : vector<8xf32> to vector<8x1xf32>
      %41 = vector.broadcast %40 : vector<8x1xf32> to vector<8x8xf32>
      %42 = arith.subf %38, %41 : vector<8x8xf32>
      %43 = math.exp %42 : vector<8x8xf32>
      %cst_31 = arith.constant dense<0.000000e+00> : vector<8xf32>
      %44 = vector.multi_reduction <add>, %43, %cst_31 [1] : vector<8x8xf32> to vector<8xf32>
      %45 = vector.shape_cast %44 : vector<8xf32> to vector<8x1xf32>
      %c0_32 = arith.constant 0 : index
      %c0_33 = arith.constant 0 : index
      %46 = vector.load %arg22[%c0_32, %c0_33] : memref<8x32xf32, #tpu.memory_space<vmem>>, vector<8x8xf32>
      %cst_34 = arith.constant dense<0.000000e+00> : vector<8x8xf32>
      %47 = tpu.matmul %43, %46, %cst_34 {dimension_numbers = #tpu.dot_dimension_numbers<[1], [0], [0], [1], [0, 0, 1, 1], [], []>} : vector<8x8xf32>, vector<8x8xf32>, vector<8x8xf32> -> vector<8x8xf32>
      %cst_35 = arith.constant 1.000000e+00 : f32
      %48 = vector.broadcast %cst_35 : f32 to vector<8x1xf32>
      %49 = arith.divf %48, %45 : vector<8x1xf32>
      %50 = vector.broadcast %49 : vector<8x1xf32> to vector<8x8xf32>
      %51 = arith.mulf %47, %50 : vector<8x8xf32>
      %c0_36 = arith.constant 0 : index
      %c0_37 = arith.constant 0 : index
      %52 = vector.load %arg23[%c0_36, %c0_37] : memref<8x32xf32, #tpu.memory_space<vmem>>, vector<8x8xf32>
      tpu.vector_store %arg23[%c0_36, %c0_37], %51 {strides = array<i32>} : memref<8x32xf32, #tpu.memory_space<vmem>>, vector<8x8xf32>,
      %53 = vector.extract_strided_slice %35 {offsets = [0, 8], sizes = [8, 8], strides = [1, 1]} : vector<8x32xf32> to vector<8x8xf32>
      %c0_38 = arith.constant 0 : index
      %c8 = arith.constant 8 : index
      %54 = vector.load %arg21[%c0_38, %c8] : memref<8x32xf32, #tpu.memory_space<vmem>>, vector<8x8xf32>
      %cst_39 = arith.constant dense<0.000000e+00> : vector<8x8xf32>
      %55 = tpu.matmul %53, %54, %cst_39 {dimension_numbers = #tpu.dot_dimension_numbers<[1], [1], [0], [0], [0, 0, 1, 0], [], []>} : vector<8x8xf32>, vector<8x8xf32>, vector<8x8xf32> -> vector<8x8xf32>
      %cst_40 = arith.constant dense<0xFF800000> : vector<8xf32>
      %56 = vector.multi_reduction <maximumf>, %55, %cst_40 [1] : vector<8x8xf32> to vector<8xf32>
      %57 = vector.shape_cast %56 : vector<8xf32> to vector<8x1xf32>
      %58 = vector.broadcast %57 : vector<8x1xf32> to vector<8x8xf32>
      %59 = arith.subf %55, %58 : vector<8x8xf32>
      %60 = math.exp %59 : vector<8x8xf32>
      %cst_41 = arith.constant dense<0.000000e+00> : vector<8xf32>
      %61 = vector.multi_reduction <add>, %60, %cst_41 [1] : vector<8x8xf32> to vector<8xf32>
      %62 = vector.shape_cast %61 : vector<8xf32> to vector<8x1xf32>
      %c0_42 = arith.constant 0 : index
      %c8_43 = arith.constant 8 : index
      %63 = vector.load %arg22[%c0_42, %c8_43] : memref<8x32xf32, #tpu.memory_space<vmem>>, vector<8x8xf32>
      %cst_44 = arith.constant dense<0.000000e+00> : vector<8x8xf32>
      %64 = tpu.matmul %60, %63, %cst_44 {dimension_numbers = #tpu.dot_dimension_numbers<[1], [0], [0], [1], [0, 0, 1, 1], [], []>} : vector<8x8xf32>, vector<8x8xf32>, vector<8x8xf32> -> vector<8x8xf32>
      %cst_45 = arith.constant 1.000000e+00 : f32
      %65 = vector.broadcast %cst_45 : f32 to vector<8x1xf32>
      %66 = arith.divf %65, %62 : vector<8x1xf32>
      %67 = vector.broadcast %66 : vector<8x1xf32> to vector<8x8xf32>
      %68 = arith.mulf %64, %67 : vector<8x8xf32>
      %c0_46 = arith.constant 0 : index
      %c8_47 = arith.constant 8 : index
      %69 = vector.load %arg23[%c0_46, %c8_47] : memref<8x32xf32, #tpu.memory_space<vmem>>, vector<8x8xf32>
      tpu.vector_store %arg23[%c0_46, %c8_47], %68 {strides = array<i32>} : memref<8x32xf32, #tpu.memory_space<vmem>>, vector<8x8xf32>,
      %70 = vector.extract_strided_slice %35 {offsets = [0, 16], sizes = [8, 8], strides = [1, 1]} : vector<8x32xf32> to vector<8x8xf32>
      %c0_48 = arith.constant 0 : index
      %c16 = arith.constant 16 : index
      %71 = vector.load %arg21[%c0_48, %c16] : memref<8x32xf32, #tpu.memory_space<vmem>>, vector<8x8xf32>
      %cst_49 = arith.constant dense<0.000000e+00> : vector<8x8xf32>
      %72 = tpu.matmul %70, %71, %cst_49 {dimension_numbers = #tpu.dot_dimension_numbers<[1], [1], [0], [0], [0, 0, 1, 0], [], []>} : vector<8x8xf32>, vector<8x8xf32>, vector<8x8xf32> -> vector<8x8xf32>
      %cst_50 = arith.constant dense<0xFF800000> : vector<8xf32>
      %73 = vector.multi_reduction <maximumf>, %72, %cst_50 [1] : vector<8x8xf32> to vector<8xf32>
      %74 = vector.shape_cast %73 : vector<8xf32> to vector<8x1xf32>
      %75 = vector.broadcast %74 : vector<8x1xf32> to vector<8x8xf32>
      %76 = arith.subf %72, %75 : vector<8x8xf32>
      %77 = math.exp %76 : vector<8x8xf32>
      %cst_51 = arith.constant dense<0.000000e+00> : vector<8xf32>
      %78 = vector.multi_reduction <add>, %77, %cst_51 [1] : vector<8x8xf32> to vector<8xf32>
      %79 = vector.shape_cast %78 : vector<8xf32> to vector<8x1xf32>
      %c0_52 = arith.constant 0 : index
      %c16_53 = arith.constant 16 : index
      %80 = vector.load %arg22[%c0_52, %c16_53] : memref<8x32xf32, #tpu.memory_space<vmem>>, vector<8x8xf32>
      %cst_54 = arith.constant dense<0.000000e+00> : vector<8x8xf32>
      %81 = tpu.matmul %77, %80, %cst_54 {dimension_numbers = #tpu.dot_dimension_numbers<[1], [0], [0], [1], [0, 0, 1, 1], [], []>} : vector<8x8xf32>, vector<8x8xf32>, vector<8x8xf32> -> vector<8x8xf32>
      %cst_55 = arith.constant 1.000000e+00 : f32
      %82 = vector.broadcast %cst_55 : f32 to vector<8x1xf32>
      %83 = arith.divf %82, %79 : vector<8x1xf32>
      %84 = vector.broadcast %83 : vector<8x1xf32> to vector<8x8xf32>
      %85 = arith.mulf %81, %84 : vector<8x8xf32>
      %c0_56 = arith.constant 0 : index
      %c16_57 = arith.constant 16 : index
      %86 = vector.load %arg23[%c0_56, %c16_57] : memref<8x32xf32, #tpu.memory_space<vmem>>, vector<8x8xf32>
      tpu.vector_store %arg23[%c0_56, %c16_57], %85 {strides = array<i32>} : memref<8x32xf32, #tpu.memory_space<vmem>>, vector<8x8xf32>,
      %87 = vector.extract_strided_slice %35 {offsets = [0, 24], sizes = [8, 8], strides = [1, 1]} : vector<8x32xf32> to vector<8x8xf32>
      %c0_58 = arith.constant 0 : index
      %c24 = arith.constant 24 : index
      %88 = vector.load %arg21[%c0_58, %c24] : memref<8x32xf32, #tpu.memory_space<vmem>>, vector<8x8xf32>
      %cst_59 = arith.constant dense<0.000000e+00> : vector<8x8xf32>
      %89 = tpu.matmul %87, %88, %cst_59 {dimension_numbers = #tpu.dot_dimension_numbers<[1], [1], [0], [0], [0, 0, 1, 0], [], []>} : vector<8x8xf32>, vector<8x8xf32>, vector<8x8xf32> -> vector<8x8xf32>
      %cst_60 = arith.constant dense<0xFF800000> : vector<8xf32>
      %90 = vector.multi_reduction <maximumf>, %89, %cst_60 [1] : vector<8x8xf32> to vector<8xf32>
      %91 = vector.shape_cast %90 : vector<8xf32> to vector<8x1xf32>
      %92 = vector.broadcast %91 : vector<8x1xf32> to vector<8x8xf32>
      %93 = arith.subf %89, %92 : vector<8x8xf32>
      %94 = math.exp %93 : vector<8x8xf32>
      %cst_61 = arith.constant dense<0.000000e+00> : vector<8xf32>
      %95 = vector.multi_reduction <add>, %94, %cst_61 [1] : vector<8x8xf32> to vector<8xf32>
      %96 = vector.shape_cast %95 : vector<8xf32> to vector<8x1xf32>
      %c0_62 = arith.constant 0 : index
      %c24_63 = arith.constant 24 : index
      %97 = vector.load %arg22[%c0_62, %c24_63] : memref<8x32xf32, #tpu.memory_space<vmem>>, vector<8x8xf32>
      %cst_64 = arith.constant dense<0.000000e+00> : vector<8x8xf32>
      %98 = tpu.matmul %94, %97, %cst_64 {dimension_numbers = #tpu.dot_dimension_numbers<[1], [0], [0], [1], [0, 0, 1, 1], [], []>} : vector<8x8xf32>, vector<8x8xf32>, vector<8x8xf32> -> vector<8x8xf32>
      %cst_65 = arith.constant 1.000000e+00 : f32
      %99 = vector.broadcast %cst_65 : f32 to vector<8x1xf32>
      %100 = arith.divf %99, %96 : vector<8x1xf32>
      %101 = vector.broadcast %100 : vector<8x1xf32> to vector<8x8xf32>
      %102 = arith.mulf %98, %101 : vector<8x8xf32>
      %c0_66 = arith.constant 0 : index
      %c24_67 = arith.constant 24 : index
      %103 = vector.load %arg23[%c0_66, %c24_67] : memref<8x32xf32, #tpu.memory_space<vmem>>, vector<8x8xf32>
      tpu.vector_store %arg23[%c0_66, %c24_67], %102 {strides = array<i32>} : memref<8x32xf32, #tpu.memory_space<vmem>>, vector<8x8xf32>,
      %c0_68 = arith.constant 0 : index
      %c0_69 = arith.constant 0 : index
      %104 = vector.load %arg23[%c0_68, %c0_69] : memref<8x32xf32, #tpu.memory_space<vmem>>, vector<8x32xf32>
      %c0_70 = arith.constant 0 : index
      %c0_71 = arith.constant 0 : index
      %105 = vector.load %arg10[%c0_70, %c0_71] : memref<32x32xf32, #tpu.memory_space<vmem>>, vector<32x32xf32>
      %cst_72 = arith.constant dense<0.000000e+00> : vector<8x32xf32>
      %106 = tpu.matmul %104, %105, %cst_72 {dimension_numbers = #tpu.dot_dimension_numbers<[1], [0], [0], [1], [0, 0, 1, 1], [], []>} : vector<8x32xf32>, vector<32x32xf32>, vector<8x32xf32> -> vector<8x32xf32>
      %c0_73 = arith.constant 0 : index
      %c0_74 = arith.constant 0 : index
      %107 = vector.load %arg11[%c0_73, %c0_74] : memref<1x32xf32, #tpu.memory_space<vmem>>, vector<1x32xf32>
      %108 = vector.broadcast %107 : vector<1x32xf32> to vector<8x32xf32>
      %109 = arith.addf %106, %108 : vector<8x32xf32>
      %110 = arith.addf %28, %109 : vector<8x32xf32>
      %c0_75 = arith.constant 0 : index
      %c0_76 = arith.constant 0 : index
      %111 = vector.load %arg12[%c0_75, %c0_76] : memref<1x32xf32, #tpu.memory_space<vmem>>, vector<1x32xf32>
      %c0_77 = arith.constant 0 : index
      %c0_78 = arith.constant 0 : index
      %112 = vector.load %arg13[%c0_77, %c0_78] : memref<1x32xf32, #tpu.memory_space<vmem>>, vector<1x32xf32>
      %cst_79 = arith.constant dense<0.000000e+00> : vector<8xf32>
      %113 = vector.multi_reduction <add>, %110, %cst_79 [1] : vector<8x32xf32> to vector<8xf32>
      %114 = vector.shape_cast %113 : vector<8xf32> to vector<8x1xf32>
      %cst_80 = arith.constant 3.200000e+01 : f32
      %115 = vector.broadcast %cst_80 : f32 to vector<8x1xf32>
      %116 = arith.divf %114, %115 : vector<8x1xf32>
      %117 = vector.broadcast %116 : vector<8x1xf32> to vector<8x32xf32>
      %118 = arith.subf %110, %117 : vector<8x32xf32>
      %119 = arith.mulf %118, %118 : vector<8x32xf32>
      %cst_81 = arith.constant dense<0.000000e+00> : vector<8xf32>
      %120 = vector.multi_reduction <add>, %119, %cst_81 [1] : vector<8x32xf32> to vector<8xf32>
      %121 = vector.shape_cast %120 : vector<8xf32> to vector<8x1xf32>
      %cst_82 = arith.constant 3.200000e+01 : f32
      %122 = vector.broadcast %cst_82 : f32 to vector<8x1xf32>
      %123 = arith.divf %121, %122 : vector<8x1xf32>
      %cst_83 = arith.constant 9.99999974E-6 : f32
      %124 = vector.broadcast %cst_83 : f32 to vector<8x1xf32>
      %125 = arith.addf %123, %124 : vector<8x1xf32>
      %126 = math.rsqrt %125 : vector<8x1xf32>
      %127 = vector.broadcast %126 : vector<8x1xf32> to vector<8x32xf32>
      %128 = arith.mulf %118, %127 : vector<8x32xf32>
      %129 = vector.broadcast %111 : vector<1x32xf32> to vector<8x32xf32>
      %130 = arith.mulf %128, %129 : vector<8x32xf32>
      %131 = vector.broadcast %112 : vector<1x32xf32> to vector<8x32xf32>
      %132 = arith.addf %130, %131 : vector<8x32xf32>
      %c0_84 = arith.constant 0 : index
      %c0_85 = arith.constant 0 : index
      %133 = vector.load %arg24[%c0_84, %c0_85] : memref<8x32xf32, #tpu.memory_space<vmem>>, vector<8x32xf32>
      tpu.vector_store %arg24[%c0_84, %c0_85], %132 {strides = array<i32>} : memref<8x32xf32, #tpu.memory_space<vmem>>, vector<8x32xf32>,
      %cst_86 = arith.constant 0.000000e+00 : f32
      %134 = vector.broadcast %cst_86 : f32 to vector<8x32xf32>
      %c0_87 = arith.constant 0 : index
      %c0_88 = arith.constant 0 : index
      %135 = vector.load %arg25[%c0_87, %c0_88] : memref<8x32xf32, #tpu.memory_space<vmem>>, vector<8x32xf32>
      tpu.vector_store %arg25[%c0_87, %c0_88], %134 {strides = array<i32>} : memref<8x32xf32, #tpu.memory_space<vmem>>, vector<8x32xf32>,
    } else {
    }
    %c0 = arith.constant 0 : index
    %c0_4 = arith.constant 0 : index
    %8 = vector.load %arg24[%c0, %c0_4] : memref<8x32xf32, #tpu.memory_space<vmem>>, vector<8x32xf32>
    %c0_5 = arith.constant 0 : index
    %c0_6 = arith.constant 0 : index
    %9 = vector.load %arg14[%c0_5, %c0_6] : memref<32x256xf32, #tpu.memory_space<vmem>>, vector<32x256xf32>
    %cst = arith.constant dense<0.000000e+00> : vector<8x256xf32>
    %10 = tpu.matmul %8, %9, %cst {dimension_numbers = #tpu.dot_dimension_numbers<[1], [0], [0], [1], [0, 0, 1, 1], [], []>} : vector<8x32xf32>, vector<32x256xf32>, vector<8x256xf32> -> vector<8x256xf32>
    %c0_7 = arith.constant 0 : index
    %c0_8 = arith.constant 0 : index
    %11 = vector.load %arg15[%c0_7, %c0_8] : memref<1x256xf32, #tpu.memory_space<vmem>>, vector<1x256xf32>
    %12 = vector.broadcast %11 : vector<1x256xf32> to vector<8x256xf32>
    %13 = arith.addf %10, %12 : vector<8x256xf32>
    %cst_9 = arith.constant 0.000000e+00 : f32
    %14 = vector.broadcast %cst_9 : f32 to vector<8x256xf32>
    %15 = arith.maximumf %13, %14 : vector<8x256xf32>
    %c0_10 = arith.constant 0 : index
    %c0_11 = arith.constant 0 : index
    %16 = vector.load %arg25[%c0_10, %c0_11] : memref<8x32xf32, #tpu.memory_space<vmem>>, vector<8x32xf32>
    %c0_12 = arith.constant 0 : index
    %c0_13 = arith.constant 0 : index
    %17 = vector.load %arg16[%c0_12, %c0_13] : memref<256x32xf32, #tpu.memory_space<vmem>>, vector<256x32xf32>
    %cst_14 = arith.constant dense<0.000000e+00> : vector<8x32xf32>
    %18 = tpu.matmul %15, %17, %cst_14 {dimension_numbers = #tpu.dot_dimension_numbers<[1], [0], [0], [1], [0, 0, 1, 1], [], []>} : vector<8x256xf32>, vector<256x32xf32>, vector<8x32xf32> -> vector<8x32xf32>
    %19 = arith.addf %16, %18 : vector<8x32xf32>
    %c0_15 = arith.constant 0 : index
    %c0_16 = arith.constant 0 : index
    %20 = vector.load %arg25[%c0_15, %c0_16] : memref<8x32xf32, #tpu.memory_space<vmem>>, vector<8x32xf32>
    tpu.vector_store %arg25[%c0_15, %c0_16], %19 {strides = array<i32>} : memref<8x32xf32, #tpu.memory_space<vmem>>, vector<8x32xf32>,
    %c0_i32_17 = arith.constant 0 : i32
    %21 = arith.cmpi eq, %arg2, %c0_i32_17 : i32
    %22 = arith.extui %21 : i1 to i32
    %c0_i32_18 = arith.constant 0 : i32
    %23 = arith.cmpi ne, %22, %c0_i32_18 : i32
    scf.if %23 {
      %c0_19 = arith.constant 0 : index
      %c0_20 = arith.constant 0 : index
      %24 = vector.load %arg25[%c0_19, %c0_20] : memref<8x32xf32, #tpu.memory_space<vmem>>, vector<8x32xf32>
      %c0_21 = arith.constant 0 : index
      %c0_22 = arith.constant 0 : index
      %25 = vector.load %arg17[%c0_21, %c0_22] : memref<1x32xf32, #tpu.memory_space<vmem>>, vector<1x32xf32>
      %26 = vector.broadcast %25 : vector<1x32xf32> to vector<8x32xf32>
      %27 = arith.addf %24, %26 : vector<8x32xf32>
      %c0_23 = arith.constant 0 : index
      %c0_24 = arith.constant 0 : index
      %28 = vector.load %arg24[%c0_23, %c0_24] : memref<8x32xf32, #tpu.memory_space<vmem>>, vector<8x32xf32>
      %29 = arith.addf %28, %27 : vector<8x32xf32>
      %c0_25 = arith.constant 0 : index
      %c0_26 = arith.constant 0 : index
      %30 = vector.load %arg18[%c0_25, %c0_26] : memref<1x32xf32, #tpu.memory_space<vmem>>, vector<1x32xf32>
      %c0_27 = arith.constant 0 : index
      %c0_28 = arith.constant 0 : index
      %31 = vector.load %arg19[%c0_27, %c0_28] : memref<1x32xf32, #tpu.memory_space<vmem>>, vector<1x32xf32>
      %cst_29 = arith.constant dense<0.000000e+00> : vector<8xf32>
      %32 = vector.multi_reduction <add>, %29, %cst_29 [1] : vector<8x32xf32> to vector<8xf32>
      %33 = vector.shape_cast %32 : vector<8xf32> to vector<8x1xf32>
      %cst_30 = arith.constant 3.200000e+01 : f32
      %34 = vector.broadcast %cst_30 : f32 to vector<8x1xf32>
      %35 = arith.divf %33, %34 : vector<8x1xf32>
      %36 = vector.broadcast %35 : vector<8x1xf32> to vector<8x32xf32>
      %37 = arith.subf %29, %36 : vector<8x32xf32>
      %38 = arith.mulf %37, %37 : vector<8x32xf32>
      %cst_31 = arith.constant dense<0.000000e+00> : vector<8xf32>
      %39 = vector.multi_reduction <add>, %38, %cst_31 [1] : vector<8x32xf32> to vector<8xf32>
      %40 = vector.shape_cast %39 : vector<8xf32> to vector<8x1xf32>
      %cst_32 = arith.constant 3.200000e+01 : f32
      %41 = vector.broadcast %cst_32 : f32 to vector<8x1xf32>
      %42 = arith.divf %40, %41 : vector<8x1xf32>
      %cst_33 = arith.constant 9.99999974E-6 : f32
      %43 = vector.broadcast %cst_33 : f32 to vector<8x1xf32>
      %44 = arith.addf %42, %43 : vector<8x1xf32>
      %45 = math.rsqrt %44 : vector<8x1xf32>
      %46 = vector.broadcast %45 : vector<8x1xf32> to vector<8x32xf32>
      %47 = arith.mulf %37, %46 : vector<8x32xf32>
      %48 = vector.broadcast %30 : vector<1x32xf32> to vector<8x32xf32>
      %49 = arith.mulf %47, %48 : vector<8x32xf32>
      %50 = vector.broadcast %31 : vector<1x32xf32> to vector<8x32xf32>
      %51 = arith.addf %49, %50 : vector<8x32xf32>
      %c0_34 = arith.constant 0 : index
      %c0_35 = arith.constant 0 : index
      %c0_36 = arith.constant 0 : index
      %52 = vector.load %arg20[%c0_34, %c0_35, %c0_36] : memref<1x8x32xf32, #tpu.memory_space<vmem>>, vector<1x8x32xf32>
      %53 = vector.shape_cast %52 : vector<1x8x32xf32> to vector<8x32xf32>
      %54 = vector.shape_cast %51 : vector<8x32xf32> to vector<1x8x32xf32>
      tpu.vector_store %arg20[%c0_34, %c0_35, %c0_36], %54 {strides = array<i32>} : memref<1x8x32xf32, #tpu.memory_space<vmem>>, vector<1x8x32xf32>,
    } else {
    }
    return
  }
  func.func @transform_0(%arg0: i32, %arg1: i32, %arg2: i32) -> (i32, i32, i32) {
    %c0_i32 = arith.constant 0 : i32
    %c0_i32_0 = arith.constant 0 : i32
    %c0_i32_1 = arith.constant 0 : i32
    return %arg0, %c0_i32, %c0_i32_0 : i32, i32, i32
  }
  func.func @transform_1(%arg0: i32, %arg1: i32, %arg2: i32) -> (i32, i32) {
    %c0_i32 = arith.constant 0 : i32
    %c0_i32_0 = arith.constant 0 : i32
    %c0_i32_1 = arith.constant 0 : i32
    return %c0_i32, %c0_i32_0 : i32, i32
  }
  func.func @transform_2(%arg0: i32, %arg1: i32, %arg2: i32) -> (i32, i32) {
    %c0_i32 = arith.constant 0 : i32
    %c0_i32_0 = arith.constant 0 : i32
    %c0_i32_1 = arith.constant 0 : i32
    return %c0_i32, %c0_i32_0 : i32, i32
  }
  func.func @transform_3(%arg0: i32, %arg1: i32, %arg2: i32) -> (i32, i32) {
    %c0_i32 = arith.constant 0 : i32
    %c0_i32_0 = arith.constant 0 : i32
    %c0_i32_1 = arith.constant 0 : i32
    return %c0_i32, %c0_i32_0 : i32, i32
  }
  func.func @transform_4(%arg0: i32, %arg1: i32, %arg2: i32) -> (i32, i32) {
    %c0_i32 = arith.constant 0 : i32
    %c0_i32_0 = arith.constant 0 : i32
    %c0_i32_1 = arith.constant 0 : i32
    return %c0_i32, %c0_i32_0 : i32, i32
  }
  func.func @transform_5(%arg0: i32, %arg1: i32, %arg2: i32) -> (i32, i32) {
    %c0_i32 = arith.constant 0 : i32
    %c0_i32_0 = arith.constant 0 : i32
    %c0_i32_1 = arith.constant 0 : i32
    return %c0_i32, %c0_i32_0 : i32, i32
  }
  func.func @transform_6(%arg0: i32, %arg1: i32, %arg2: i32) -> (i32, i32) {
    %c0_i32 = arith.constant 0 : i32
    %c0_i32_0 = arith.constant 0 : i32
    %c0_i32_1 = arith.constant 0 : i32
    return %c0_i32, %c0_i32_0 : i32, i32
  }
  func.func @transform_7(%arg0: i32, %arg1: i32, %arg2: i32) -> (i32, i32) {
    %c0_i32 = arith.constant 0 : i32
    %c0_i32_0 = arith.constant 0 : i32
    %c0_i32_1 = arith.constant 0 : i32
    return %c0_i32, %c0_i32_0 : i32, i32
  }
  func.func @transform_8(%arg0: i32, %arg1: i32, %arg2: i32) -> (i32, i32) {
    %c0_i32 = arith.constant 0 : i32
    %c0_i32_0 = arith.constant 0 : i32
    %c0_i32_1 = arith.constant 0 : i32
    return %c0_i32, %c0_i32_0 : i32, i32
  }
  func.func @transform_9(%arg0: i32, %arg1: i32, %arg2: i32) -> (i32, i32) {
    %c0_i32 = arith.constant 0 : i32
    %c0_i32_0 = arith.constant 0 : i32
    %c0_i32_1 = arith.constant 0 : i32
    return %c0_i32, %c0_i32_0 : i32, i32
  }
  func.func @transform_10(%arg0: i32, %arg1: i32, %arg2: i32) -> (i32, i32) {
    %c0_i32 = arith.constant 0 : i32
    %c0_i32_0 = arith.constant 0 : i32
    %c0_i32_1 = arith.constant 0 : i32
    return %c0_i32, %c0_i32_0 : i32, i32
  }
  func.func @transform_11(%arg0: i32, %arg1: i32, %arg2: i32) -> (i32, i32) {
    %c0_i32 = arith.constant 0 : i32
    %c0_i32_0 = arith.constant 0 : i32
    return %c0_i32, %arg2 : i32, i32
  }
  func.func @transform_12(%arg0: i32, %arg1: i32, %arg2: i32) -> (i32, i32) {
    %c0_i32 = arith.constant 0 : i32
    %c0_i32_0 = arith.constant 0 : i32
    return %c0_i32, %arg2 : i32, i32
  }
  func.func @transform_13(%arg0: i32, %arg1: i32, %arg2: i32) -> (i32, i32) {
    %c0_i32 = arith.constant 0 : i32
    %c0_i32_0 = arith.constant 0 : i32
    return %arg2, %c0_i32 : i32, i32
  }
  func.func @transform_14(%arg0: i32, %arg1: i32, %arg2: i32) -> (i32, i32) {
    %c0_i32 = arith.constant 0 : i32
    %c0_i32_0 = arith.constant 0 : i32
    %c0_i32_1 = arith.constant 0 : i32
    return %c0_i32, %c0_i32_0 : i32, i32
  }
  func.func @transform_15(%arg0: i32, %arg1: i32, %arg2: i32) -> (i32, i32) {
    %c0_i32 = arith.constant 0 : i32
    %c0_i32_0 = arith.constant 0 : i32
    %c0_i32_1 = arith.constant 0 : i32
    return %c0_i32, %c0_i32_0 : i32, i32
  }
  func.func @transform_16(%arg0: i32, %arg1: i32, %arg2: i32) -> (i32, i32) {
    %c0_i32 = arith.constant 0 : i32
    %c0_i32_0 = arith.constant 0 : i32
    %c0_i32_1 = arith.constant 0 : i32
    return %c0_i32, %c0_i32_0 : i32, i32
  }
  func.func @transform_17(%arg0: i32, %arg1: i32, %arg2: i32) -> (i32, i32, i32) {
    %c0_i32 = arith.constant 0 : i32
    %c0_i32_0 = arith.constant 0 : i32
    return %arg0, %arg1, %c0_i32 : i32, i32, i32
  }
}

</mosaic_0001>

<bundles_post_ra>
// kernel: tpu_custom_call.1
= control target key start
LH: loop header
LB: loop body
LE: loop exit
PB: predicated region body
PF: predicated region fallthrough
CT: control target
= control target key end

     0   :  { %s2942_s0 = inlined_call_operand.vmem [shape: f32[2,8,32], index: 0, kind: input, shape index: {}]   ;;  %s2943_s1 = inlined_call_operand.vmem [shape: f32[32,32], index: 1, kind: input, shape index: {}]   ;;  %s2944_s2 = inlined_call_operand.vmem [shape: f32[1,32], index: 2, kind: input, shape index: {}]   ;;  %s2945_s3 = inlined_call_operand.vmem [shape: f32[32,32], index: 3, kind: input, shape index: {}]   ;;  %s2946_s4 = inlined_call_operand.vmem [shape: f32[1,32], index: 4, kind: input, shape index: {}]   ;;  %s2947_s5 = inlined_call_operand.vmem [shape: f32[32,32], index: 5, kind: input, shape index: {}]   ;;  %s2948_s6 = inlined_call_operand.vmem [shape: f32[1,32], index: 6, kind: input, shape index: {}]   ;;  %s2949_s7 = inlined_call_operand.vmem [shape: f32[32,32], index: 7, kind: input, shape index: {}]   ;;  %s2950_s8 = inlined_call_operand.vmem [shape: f32[1,32], index: 8, kind: input, shape index: {}]   ;;  %s2951_s9 = inlined_call_operand.vmem [shape: f32[1,32], index: 9, kind: input, shape index: {}]   ;;  %s2952_s10 = inlined_call_operand.vmem [shape: f32[1,32], index: 10, kind: input, shape index: {}]   ;;  %s2953_s11 = inlined_call_operand.vmem [shape: f32[32,256], index: 11, kind: input, shape index: {}]   ;;  %s2954_s12 = inlined_call_operand.vmem [shape: f32[1,256], index: 12, kind: input, shape index: {}]   ;;  %s2955_s13 = inlined_call_operand.vmem [shape: f32[256,32], index: 13, kind: input, shape index: {}]   ;;  %s2956_s14 = inlined_call_operand.vmem [shape: f32[1,32], index: 14, kind: input, shape index: {}]   ;;  %s2957_s15 = inlined_call_operand.vmem [shape: f32[1,32], index: 15, kind: input, shape index: {}]   ;;  %s2958_s16 = inlined_call_operand.vmem [shape: f32[1,32], index: 16, kind: input, shape index: {}]   ;;  %s2959_s17 = inlined_call_operand.hbm [shape: f32[2,8,32], index: 17, kind: output, shape index: {}]  }
   0x1   :  { %2965 = sst [smem:[#allocation15_spill]] %s2942_s0 }
   0x2   :  { %2966 = sst [smem:[#allocation16_spill]] %s2943_s1 }
   0x3   :  { %2967 = sst [smem:[#allocation17_spill]] %s2944_s2 }
   0x4   :  { %2968 = sst [smem:[#allocation18_spill]] %s2945_s3 }
   0x5   :  { %2969 = sst [smem:[#allocation19_spill]] %s2946_s4 }
   0x6   :  { %2970 = sst [smem:[#allocation20_spill]] %s2947_s5 }
   0x7   :  { %22 = vsyncpa [#allocation8], 0 }
   0x8   :  { %24 = vsyncpa [#allocation8 + $0x1], 0  ;;  %s2539_s24 = smov 0   ;;  %s2541_s25 = smov 0  }
   0x9   :  { %s2543_s26 = smov 0   ;;  %s2545_s27 = smov 0  }
   0xa   :  { %s2547_s28 = smov 0   ;;  %s2549_s29 = smov 0  }
   0xb LB: > { %2971 = sst [smem:[#allocation10_spill]] %s2426_s26  ;;  %s2084_s0 = sadd.s32 4294967295, %s2438_s29   ;;  %s2438_s29 = sphi %s2549_s29, %s30_s29   ;;  %s2434_s28 = sphi %s2547_s28, %s2988_s28   ;;  %s2430_s27 = sphi %s2545_s27, %s2992_s27   ;;  %s2426_s26 = sphi %s2543_s26, %s2991_s26   ;;  %s2422_s25 = sphi %s2541_s25, %s2990_s25   ;;  %s2418_s24 = sphi %s2539_s24, %s2989_s24  }
   0xc   : > { %2972 = sst [smem:[#allocation11_spill]] %s2434_s28  ;;  %s2085_s30 = sadd.s32 4294967294, %s2438_s29  }
   0xd   : > { %s49_s18 = sadd.s32 1, %s2434_s28  ;;  %s435_s19 = sadd.s32 1, %s2426_s26 }
   0xe   : > { %p51_p0 = scmp.ge.s32.totalorder %s49_s18, 2  ;;  %p445_p1 = scmp.ne.s32.totalorder %s2426_s26, %s2422_s25 }
   0xf   : > { %p446_p2 = scmp.eq.s32.totalorder %s2084_s0, 1  ;;  %p451_p3 = scmp.ne.s32.totalorder %s2422_s25, %s2418_s24 }
  0x10   : > { %s2994_s18 = smov (%p51_p0, %s49_s18), 0  ;;  %p452_p5 = scmp.eq.s32.totalorder %s2085_s30, 1 }
  0x11   : > { %2973 = sst [smem:[#allocation12_spill]] %s2994_s18  ;;  %p2579_p4 = por %p446_p2, %p445_p1 }
  0x12   : > { %s430_s20 = ssub.s32 %s2434_s28, %s2994_s18  ;;  %p2091_p6 = scmp.ge.s32.totalorder %s2438_s29, 1 }
  0x13   : > { %p433_p7 = scmp.eq.s32.totalorder %s430_s20, 0  ;;  %p2586_p8 = por %p452_p5, %p451_p3 }
  0x14   : > { %p542_p9 = scmp.lt.s32.totalorder %s2438_s29, 3 }
  0x15   : > { %s2975_s21 = scalar_select %p2586_p8, 1, 0 }
  0x16   : > { %s2592_s22 = scalar_select %p433_p7, %s2426_s26, %s435_s19  }
  0x17   : > { %2976 = sst [smem:[#allocation13_spill]] %s2975_s21  ;;  %p543_p10 = pnand %p2091_p6, %p542_p9 }
  0x18   : > { %2977 = sst [smem:[#allocation14_spill]] %s2592_s22  ;;  %p607_p11 = scmp.lt.s32.totalorder (!%p543_p10), %s2430_s27, 1 }
  0x19   : > { %546 = sbr.rel (%p543_p10) target bundleno = 2288 (0x8f0), region = 88  ;;  %s2978_s3 = sld [smem:[#allocation18_spill]] (!%p543_p10) }
  0x1a   : > { %s2979_s26 = sld [smem:[#allocation15_spill]] (!%p543_p10)  ;;  %s2442_s18 = smov (!%p543_p10), 112  }
  0x1b   : > { %s2980_s5 = sld [smem:[#allocation20_spill]] (!%p543_p10)  ;;  %s2446_s22 = smov (!%p543_p10), 16  }
  0x1c   : > { %s2981_s23 = sld [smem:[#allocation16_spill]] (!%p543_p10)  ;;  %s604_s20 = sand.u32 (!%p543_p10), 1, %s2422_s25  }
  0x1d   : > { %s2982_s4 = sld [smem:[#allocation19_spill]] (!%p543_p10)  ;;  %s2092_s0 = sshll.u32 (!%p543_p10), %s604_s20, 3 }
  0x1e   : > { %v2440_v1 = vmov 0.0   ;;  %vm2441_vm0 = vmmov 0   ;;  %vm646_vm1 = vcmask 261120   ;;  %s608_s19 = scalar_select %p607_p11, %s2430_s27, 1  ;;  %v2096_v18 = vld [vmem:[%s2948_s6] ss:$0 sm:$0xff] }
  0x1f   : > { %v638_v0 = vld [vmem:[%s2978_s3 + $0x18] sm:$0xff]  ;;  %2195 = vmatprep.subr.mxu1 %v2440_v1  ;;  %v637_v2 = vld [vmem:[%s2978_s3 + $0x10] sm:$0xff]  ;;  %2203 = vmatprep.mubr.msk.f32.mxu1 %vm2441_vm0, %v2440_v1  ;;  %1705 = vst.msk [vmem:[#allocation6] sm:$0xff] %vm646_vm1, %v2440_v1  ;;  %v636_v3 = vld [vmem:[%s2978_s3 + $0x8] sm:$0xff]  ;;  %vm896_vm2 = vcmask 64512   ;;  %s2983_s2 = sld [smem:[#allocation17_spill]] }
  0x20   : > { %2196 = vmatpush3.msra.mxu1 %v638_v0  ;;  %2238 = vmatprep.subr.mxu0 %v2440_v1  ;;  %s2093_s30 = sshll.u32 %s608_s19, 3  ;;  %v635_v4 = vld [vmem:[%s2978_s3] sm:$0xff]  ;;  %s2443_s19 = smov 120   ;;  %vm1234_vm3 = vcmask 130112   ;;  %vm1410_vm4 = vcmask 195712   ;;  %vm1586_vm5 = vcmask 261312  }
  0x21   : > { %2197 = vmatprep.subr.mxu1 %v2440_v1  ;;  %2240 = vmatprep.mubr.msk.f32.mxu0 %vm2441_vm0, %v2440_v1  ;;  %s610_s21 = scalar_lea.vmem %s2979_s26, %s2093_s30  ;;  %v723_v6 = vld [vmem:[%s2980_s5 + $0x18] sm:$0xff]  ;;  %v722_v7 = vld [vmem:[%s2980_s5 + $0x10] sm:$0xff]  ;;  %v721_v8 = vld [vmem:[%s2980_s5 + $0x8] sm:$0xff]  ;;  %s2447_s30 = smov 24  }
  0x22   : > { %2198 = vmatpush3.msra.mxu1 %v637_v2  ;;  %v2621_v5 = vld [vmem:[%s610_s21] sm:$0xff]  ;;  %v812_v10 = vld [vmem:[%s2981_s23 + $0x18] sm:$0xff]  ;;  %v811_v11 = vld [vmem:[%s2981_s23 + $0x10] sm:$0xff]  ;;  %s2444_s21 = smov 104  }
  0x23   : > { %2199 = vmatprep.subr.mxu1 %v2440_v1  ;;  %v720_v9 = vld [vmem:[%s2980_s5] sm:$0xff]  ;;  %v810_v12 = vld [vmem:[%s2981_s23 + $0x8] sm:$0xff]  ;;  %s1955_s5 = scalar_lea.sflag [#allocation8], %s604_s20 }
  0x24   : > { %2200 = vmatpush3.msra.mxu1 %v636_v3  ;;  %v809_v13 = vld [vmem:[%s2981_s23] sm:$0xff] }
  0x25   : > { %2201 = vmatprep.subr.mxu1 %v2440_v1  ;;  %v2094_v14 = vld [vmem:[%s2982_s4] ss:$0 sm:$0xff] }
  0x26   : > { %2202 = vmatpush3.msra.mxu1 %v635_v4  ;;  %v2098_v23 = vld [vmem:[%s2983_s2] ss:$0 sm:$0xff] }
  0x27   : > { %2204 = vmatmul.mubr.msk.f32.vlgmr.msra.gmra.mxu1 %vm646_vm1, %v2621_v5  ;;  %2206 = vmatprep.subr.mxu1 %v2440_v1 }
  0x28   : > { %2207 = vmatpush3.msra.mxu1 %v723_v6  ;;  %2214 = vmatprep.mubr.msk.f32.mxu1 %vm2441_vm0, %v2440_v1 }
  0x29   : > { %2208 = vmatprep.subr.mxu1 %v2440_v1 }
  0x2a   : > { %2209 = vmatpush3.msra.mxu1 %v722_v7 }
  0x2b   : > { %2210 = vmatprep.subr.mxu1 %v2440_v1 }
  0x2c   : > { %2211 = vmatpush3.msra.mxu1 %v721_v8 }
  0x2d   : > { %2212 = vmatprep.subr.mxu1 %v2440_v1 }
  0x2e   : > { %2213 = vmatpush3.msra.mxu1 %v720_v9 }
  0x2f   : > { %2215 = vmatmul.mubr.msk.f32.vlgmr.msra.gmra.mxu1 %vm646_vm1, %v2621_v5  ;;  %2217 = vmatprep.subr.mxu1 %v2440_v1 }
  0x30   : > { %2218 = vmatpush3.msra.mxu1 %v812_v10  ;;  %2225 = vmatprep.mubr.msk.f32.mxu1 %vm2441_vm0, %v2440_v1 }
  0x31   : > { %2219 = vmatprep.subr.mxu1 %v2440_v1 }
  0x32   : > { %2220 = vmatpush3.msra.mxu1 %v811_v11 }
  0x33   : > { %2221 = vmatprep.subr.mxu1 %v2440_v1 }
  0x34   : > { %2222 = vmatpush3.msra.mxu1 %v810_v12 }
  0x35   : > { %2223 = vmatprep.subr.mxu1 %v2440_v1 }
  0x36   : > { %2224 = vmatpush3.msra.mxu1 %v809_v13 }
  0x37   : > { %2226 = vmatmul.mubr.msk.f32.vlgmr.msra.gmra.mxu1 %vm646_vm1, %v2621_v5  ;;  %2228 = vmatprep.subr.mxu1 %v2440_v1 }
  0x38   : > { %2230 = vmatprep.mubr.msk.f32.mxu1 %vm2441_vm0, %v2440_v1 }
  0xe7   : > { %v716_v15 = vpop.f32.mrf.mxu1 }
  0xe8   : > { %v717_v16 = vadd.f32 %v2094_v14, %v716_v15 }
  0xe9   : > { %v2205_v17 = vpop.f32.mrf.mxu1 }
  0xea   : > { %801 = vst.msk [vmem:[#allocation2] sm:$0xff] %vm646_vm1, %v717_v16  ;;  %v1592_v16 = vld [vmem:[%s2949_s7 + $0x18] sm:$0xff]  ;;  %v1591_v17 = vld [vmem:[%s2949_s7 + $0x10] sm:$0xff] }
  0xef   : > { %v797_v19 = vpop.f32.mrf.mxu1 }
  0xf0   : > { %v798_v20 = vadd.f32 %v2096_v18, %v797_v19 }
  0xf1   : > { %v2216_v21 = vpop.f32.mrf.mxu1  ;;  %v1236_v22 = vld [vmem:[#allocation2] sm:$0xff] }
  0xf2   : > { %802 = vst.msk [vmem:[#allocation3] sm:$0xff] %vm646_vm1, %v798_v20  ;;  %1240 = vrot.lane.b32.xlu1 %v1236_v22, %s2442_s18  ;;  %1064 = vrot.lane.b32.xlu0 %v1236_v22, %s2443_s19  ;;  %v1590_v20 = vld [vmem:[%s2949_s7 + $0x8] sm:$0xff] }
  0xf3   : > { %2229 = vmatpush3.xpose.msk.msra.mxu1 %vm896_vm2, %v1236_v22 }
  0xf4   : > { %2233 = vmatprep.subr.mxu1 %v2440_v1 }
  0xf7   : > { %v890_v24 = vpop.f32.mrf.mxu1 }
  0xf8   : > { %v891_v25 = vadd.f32 %v2098_v23, %v890_v24  ;;  %v1589_v23 = vld [vmem:[%s2949_s7] sm:$0xff] }
  0xf9   : > { %v2227_v26 = vpop.f32.mrf.mxu1  ;;  %v982_v28 = vld [vmem:[#allocation3] sm:$0xff] }
  0xfa   : > { %v894_v27 = vmul.f32 0.35355338, %v891_v25 }
  0xfc   : > { %1237 = vrot.lane.b32.xlu1 %v894_v27, %s2442_s18  ;;  %1061 = vrot.lane.b32.xlu0 %v894_v27, %s2443_s19 }
  0xfd   : > { %2231 = vmatmul.mubr.msk.f32.vlgmr.msra.gmra.mxu1 %vm896_vm2, %v894_v27 }
  0xfe   : > { %2234 = vmatpush3.msra.mxu1 %v982_v28  ;;  %2235 = vmatprep.mubr.msk.f32.mxu1 %vm2441_vm0, %v2440_v1 }
  0xff   : > { %2243 = vmatprep.subr.mxu1 %v2440_v1 }
 0x100   : > { %1413 = vrot.lane.b32.xlu1 %v894_v27, %s2444_s21  ;;  %1416 = vrot.lane.b32.xlu0 %v1236_v22, %s2444_s21 }
 0x164   : > { %v1065_v29 = vpop.permute.xlu0 %1064  ;;  %v1241_v30 = vpop.permute.xlu1 %1240 }
 0x165   : > { %2239 = vmatpush3.xpose.msk.msra.mxu0 %vm896_vm2, %v1065_v29 }
 0x166   : > { %2248 = vmatprep.subr.mxu0 %v2440_v1 }
 0x16e   : > { %v1062_v31 = vpop.permute.xlu0 %1061  ;;  %v1238_v32 = vpop.permute.xlu1 %1237 }
 0x16f   : > { %2241 = vmatmul.mubr.msk.f32.vlgmr.msra.gmra.mxu0 %vm896_vm2, %v1062_v31 }
 0x170   : > { %2249 = vmatpush3.xpose.msk.msra.mxu0 %vm896_vm2, %v1241_v30  ;;  %2250 = vmatprep.mubr.msk.f32.mxu0 %vm2441_vm0, %v2440_v1 }
 0x171   : > { %2258 = vmatprep.subr.mxu0 %v2440_v1 }
 0x172   : > { %v1417_v33 = vpop.permute.xlu0 %1416  ;;  %v1414_v34 = vpop.permute.xlu1 %1413 }
 0x173   : > { %2251 = vmatmul.mubr.msk.f32.vlgmr.msra.gmra.mxu0 %vm896_vm2, %v1238_v32 }
 0x174   : > { %2259 = vmatpush3.xpose.msk.msra.mxu0 %vm896_vm2, %v1417_v33  ;;  %2260 = vmatprep.mubr.msk.f32.mxu0 %vm2441_vm0, %v2440_v1 }
 0x175   : > { %2268 = vmatprep.subr.mxu0 %v2440_v1 }
 0x177   : > { %2261 = vmatmul.mubr.msk.f32.vlgmr.msra.gmra.mxu0 %vm896_vm2, %v1414_v34 }
 0x178   : > { %2276 = vmatprep.mubr.msk.f32.mxu0 %vm2441_vm0, %v2440_v1  ;;  %2269 = vmatpush3.msra.mxu0 %v1592_v16 }
 0x179   : > { %2270 = vmatprep.subr.mxu0 %v2440_v1 }
 0x17a   : > { %2271 = vmatpush3.msra.mxu0 %v1591_v17 }
 0x17b   : > { %2272 = vmatprep.subr.mxu0 %v2440_v1 }
 0x17c   : > { %2273 = vmatpush3.msra.mxu0 %v1590_v20 }
 0x17d   : > { %2274 = vmatprep.subr.mxu0 %v2440_v1 }
 0x17e   : > { %2275 = vmatpush3.msra.mxu0 %v1589_v23 }
 0x1bd   : > { %v969_v35 = vpop.f32.mrf.mxu1 }
 0x1be   : > { %v973_v36 = vsel %vm896_vm2, %v969_v35, -inf }
 0x1bf   : > { %974 = vmax.xlane.f32.xlu0 %v973_v36  ;;  %v2232_v37 = vpop.f32.mrf.mxu1 }
 0x22f   : > { %v1136_v38 = vpop.f32.mrf.mxu0 }
 0x230   : > { %v1140_v39 = vsel %vm896_vm2, %v1136_v38, -inf }
 0x231   : > { %1141 = vmax.xlane.f32.xlu1 %v1140_v39  ;;  %v2242_v40 = vpop.f32.mrf.mxu0 }
 0x233   : > { %v1312_v41 = vpop.f32.mrf.mxu0 }
 0x234   : > { %v1316_v42 = vsel %vm896_vm2, %v1312_v41, -inf }
 0x235   : > { %v2252_v43 = vpop.f32.mrf.mxu0  ;;  %1317 = vmax.xlane.f32.xlu0 %v1316_v42 }
 0x237   : > { %v1488_v44 = vpop.f32.mrf.mxu0 }
 0x238   : > { %v1492_v45 = vsel %vm896_vm2, %v1488_v44, -inf }
 0x239   : > { %v2262_v46 = vpop.f32.mrf.mxu0  ;;  %1493 = vmax.xlane.f32.xlu0 %v1492_v45 }
 0x23a   : > { %v1714_v46 = vld [vmem:[%s2953_s11 + $0x38] sm:$0xff] }
 0x242   : > { %1151 = vrot.lane.b32.xlu1 %v982_v28, %s2443_s19  ;;  %s2448_s19 = smov [#allocation7]  }
 0x243   : > { %s2366_s26 = sshll.u32 %s2448_s19, 4  ;;  %s2367_s26 = int_to_ptr.vmem [resolvable:$false] %s2366_s26 }
 0x246   : > { %1503 = vrot.lane.b32.xlu1 %v982_v28, %s2444_s21  ;;  %s2445_s21 = smov 8  }
 0x248   : > { %v975_v47 = vpop.xlane.xlu0 %974 }
 0x249   : > { %v976_v48 = vsub.f32 %v969_v35, %v975_v47  ;;  %v2112_v35 = vld [vmem:[%s2950_s8] ss:$0 sm:$0xff]  ;;  %v1712_v47 = vld [vmem:[%s2953_s11 + $0x28] sm:$0xff] }
 0x24b   : > { %v977_v49 = vmul.f32 1.442695, %v976_v48  ;;  %v1711_v48 = vld [vmem:[%s2953_s11 + $0x20] sm:$0xff] }
 0x24d   : > { %2342 = vpow2.f32 %v977_v49  ;;  %v1710_v49 = vld [vmem:[%s2953_s11 + $0x18] sm:$0xff] }
 0x24f   : > { %1327 = vrot.lane.b32.xlu0 %v982_v28, %s2442_s18 }
 0x25a   : > { %v2343_v50 = vpop.eup %2342 }
 0x25b   : > { %2236 = vmatmul.mubr.msk.f32.vlgmr.msra.gmra.mxu1 %vm896_vm2, %v2343_v50  ;;  %v979_v3 = vsel %vm896_vm2, %v2343_v50, 0.0  ;;  %v1709_v50 = vld [vmem:[%s2953_s11 + $0x10] sm:$0xff] }
 0x25c   : > { %2245 = vmatprep.mubr.msk.f32.mxu1 %vm2441_vm0, %v2440_v1 }
 0x2ba   : > { %v1142_v51 = vpop.xlane.xlu1 %1141 }
 0x2bb   : > { %v1143_v52 = vsub.f32 %v1136_v38, %v1142_v51  ;;  %v1708_v51 = vld [vmem:[%s2953_s11 + $0x8] sm:$0xff] }
 0x2bd   : > { %v1144_v53 = vmul.f32 1.442695, %v1143_v52  ;;  %v1707_v52 = vld [vmem:[%s2953_s11] sm:$0xff] }
 0x2be   : > { %v1152_v54 = vpop.permute.xlu1 %1151  ;;  %v1318_v55 = vpop.xlane.xlu0 %1317 }
 0x2bf   : > { %2344 = vpow2.f32 %v1144_v53  ;;  %v1319_v56 = vsub.f32 %v1312_v41, %v1318_v55  ;;  %2244 = vmatpush3.msra.mxu1 %v1152_v54  ;;  %v1836_v53 = vld [vmem:[%s2955_s13 + $0xf8] sm:$0xff]  ;;  %v1835_v55 = vld [vmem:[%s2955_s13 + $0xf0] sm:$0xff] }
 0x2c0   : > { %2253 = vmatprep.subr.mxu1 %v2440_v1  ;;  %v1820_v54 = vld [vmem:[%s2955_s13 + $0x78] sm:$0xff]  ;;  %2160 = vmatprep.subr.mxu0 %v1836_v53 }
 0x2c1   : > { %v1320_v57 = vmul.f32 1.442695, %v1319_v56  ;;  %v1819_v56 = vld [vmem:[%s2955_s13 + $0x70] sm:$0xff] }
 0x2c2   : > { %v1494_v58 = vpop.xlane.xlu0 %1493  ;;  %v1504_v2 = vpop.permute.xlu1 %1503 }
 0x2c3   : > { %2346 = vpow2.f32 %v1320_v57  ;;  %v1495_v59 = vsub.f32 %v1488_v44, %v1494_v58  ;;  %v1834_v57 = vld [vmem:[%s2955_s13 + $0xe8] sm:$0xff] }
 0x2c4   : > { %v1818_v58 = vld [vmem:[%s2955_s13 + $0x68] sm:$0xff] }
 0x2c5   : > { %v1496_v60 = vmul.f32 1.442695, %v1495_v59  ;;  %v1833_v59 = vld [vmem:[%s2955_s13 + $0xe0] sm:$0xff] }
 0x2c6   : > { %v1328_v62 = vpop.permute.xlu0 %1327 }
 0x2c7   : > { %2348 = vpow2.f32 %v1496_v60  ;;  %v1817_v60 = vld [vmem:[%s2955_s13 + $0x60] sm:$0xff] }
 0x2cc   : > { %v2345_v61 = vpop.eup %2344 }
 0x2cd   : > { %2246 = vmatmul.mubr.msk.f32.vlgmr.msra.gmra.mxu1 %vm896_vm2, %v2345_v61  ;;  %v1146_v63 = vsel %vm896_vm2, %v2345_v61, 0.0  ;;  %v1832_v61 = vld [vmem:[%s2955_s13 + $0xd8] sm:$0xff] }
 0x2ce   : > { %2254 = vmatpush3.msra.mxu1 %v1328_v62  ;;  %1147 = vadd.xlane.f32.xlu1 %v1146_v63  ;;  %v1816_v62 = vld [vmem:[%s2955_s13 + $0x58] sm:$0xff]  ;;  %v1831_v63 = vld [vmem:[%s2955_s13 + $0xd0] sm:$0xff] }
 0x2cf   : > { %2255 = vmatprep.mubr.msk.f32.mxu1 %vm2441_vm0, %v2440_v1  ;;  %2263 = vmatprep.subr.mxu1 %v2440_v1 }
 0x2d0   : > { %v2347_v0 = vpop.eup %2346 }
 0x2d1   : > { %2256 = vmatmul.mubr.msk.f32.vlgmr.msra.gmra.mxu1 %vm896_vm2, %v2347_v0  ;;  %v1322_v4 = vsel %vm896_vm2, %v2347_v0, 0.0  ;;  %v1815_v0 = vld [vmem:[%s2955_s13 + $0x50] sm:$0xff] }
 0x2d2   : > { %2264 = vmatpush3.msra.mxu1 %v1504_v2  ;;  %980 = vadd.xlane.f32.xlu1 %v979_v3  ;;  %v1830_v2 = vld [vmem:[%s2955_s13 + $0xc8] sm:$0xff] }
 0x2d3   : > { %1323 = vadd.xlane.f32.xlu0 %v1322_v4  ;;  %2265 = vmatprep.mubr.msk.f32.mxu1 %vm2441_vm0, %v2440_v1  ;;  %v1814_v3 = vld [vmem:[%s2955_s13 + $0x48] sm:$0xff]  ;;  %v1829_v4 = vld [vmem:[%s2955_s13 + $0xc0] sm:$0xff] }
 0x2d4   : > { %v2349_v6 = vpop.eup %2348  ;;  %1755 = vmatprep.subr.mxu1 %v1714_v46  ;;  %v1804_v46 = vld [vmem:[#allocation6] sm:$0xff] }
 0x2d5   : > { %2266 = vmatmul.mubr.msk.f32.vlgmr.msra.gmra.mxu1 %vm896_vm2, %v2349_v6  ;;  %v1498_v7 = vsel %vm896_vm2, %v2349_v6, 0.0  ;;  %v1813_v6 = vld [vmem:[%s2955_s13 + $0x40] sm:$0xff] }
 0x2d6   : > { %1795 = vmatprep.mubr.f32.mxu1 %v2440_v1 }
 0x2d7   : > { %1499 = vadd.xlane.f32.xlu0 %v1498_v7  ;;  %v1828_v7 = vld [vmem:[%s2955_s13 + $0xb8] sm:$0xff] }
 0x31b   : > { %v1052_v8 = vpop.f32.mrf.mxu1 }
 0x31d   : > { %v2237_v9 = vpop.f32.mrf.mxu1 }
 0x31e   : > { %v1827_v9 = vld [vmem:[%s2955_s13 + $0xb0] sm:$0xff] }
 0x357   : > { %v1148_v10 = vpop.xlane.xlu1 %1147 }
 0x35b   : > { %v981_v11 = vpop.xlane.xlu1 %980 }
 0x35c   : > { %2350 = vrcp.f32 %v981_v11  ;;  %v1324_v14 = vpop.xlane.xlu0 %1323  ;;  %v1826_v11 = vld [vmem:[%s2955_s13 + $0xa8] sm:$0xff] }
 0x35d   : > { %2352 = vrcp.f32 %v1148_v10  ;;  %v1811_v10 = vld [vmem:[%s2955_s13 + $0x30] sm:$0xff] }
 0x35e   : > { %2354 = vrcp.f32 %v1324_v14  ;;  %v1809_v14 = vld [vmem:[%s2955_s13 + $0x20] sm:$0xff] }
 0x360   : > { %v1500_v15 = vpop.xlane.xlu0 %1499 }
 0x361   : > { %2356 = vrcp.f32 %v1500_v15 }
 0x369   : > { %v2351_v12 = vpop.eup %2350 }
 0x36a   : > { %v1058_v13 = vmul.f32 %v2351_v12, %v1052_v8  ;;  %v2353_v18 = vpop.eup %2352  ;;  %v1812_v8 = vld [vmem:[%s2955_s13 + $0x38] sm:$0xff]  ;;  %v1810_v12 = vld [vmem:[%s2955_s13 + $0x28] sm:$0xff] }
 0x36b   : > { %v2355_v24 = vpop.eup %2354 }
 0x36c   : > { %1059 = vst.msk [vmem:[#allocation4] sm:$0xff] %vm896_vm2, %v1058_v13  ;;  %v1825_v13 = vld [vmem:[%s2955_s13 + $0xa0] sm:$0xff] }
 0x36e   : > { %v2357_v28 = vpop.eup %2356 }
 0x38d   : > { %v1223_v19 = vpop.f32.mrf.mxu1 }
 0x38e   : > { %v1229_v21 = vmul.f32 %v2353_v18, %v1223_v19  ;;  %v2114_v19 = vld [vmem:[%s2951_s9] ss:$0 sm:$0xff] }
 0x38f   : > { %v2247_v22 = vpop.f32.mrf.mxu1 }
 0x390   : > { %1231 = vrot.lane.b32.xlu0 %v1229_v21, %s2445_s21  ;;  %v2115_v21 = vld [vmem:[%s2952_s10] ss:$0 sm:$0xff]  ;;  %s2121_s21 = sshll.u32 %s2430_s27, 7  ;;  %s2368_s27 = scalar_lea.vmem %s2367_s26, 256 }
 0x391   : > { %v1399_v25 = vpop.f32.mrf.mxu1  ;;  %s1967_s4 = scalar_lea.hbm %s2959_s17, %s2121_s21 }
 0x392   : > { %v1405_v26 = vmul.f32 %v2355_v24, %v1399_v25  ;;  %v1824_v25 = vld [vmem:[%s2955_s13 + $0x98] sm:$0xff] }
 0x393   : > { %v2257_v27 = vpop.f32.mrf.mxu1 }
 0x394   : > { %1407 = vrot.lane.b32.xlu1 %v1405_v26, %s2446_s22  ;;  %v1808_v26 = vld [vmem:[%s2955_s13 + $0x18] sm:$0xff]  ;;  %v1823_v27 = vld [vmem:[%s2955_s13 + $0x90] sm:$0xff]  ;;  %s606_s22 = scalar_lea.vmem [#allocation7], %s2092_s0 }
 0x395   : > { %v1575_v29 = vpop.f32.mrf.mxu1  ;;  %s1969_s2 = sshll.u32 %s606_s22, 4  ;;  %s1970_s2 = int_to_ptr.vmem [resolvable:$true] %s1969_s2 }
 0x396   : > { %v1581_v30 = vmul.f32 %v2357_v28, %v1575_v29  ;;  %v1807_v28 = vld [vmem:[%s2955_s13 + $0x10] sm:$0xff]  ;;  %v1822_v29 = vld [vmem:[%s2955_s13 + $0x88] sm:$0xff]  ;;  %s2362_s18 = scalar_lea.vmem %s1970_s2, 128  ;;  %p2369_p1 = scmp.lt.s32.totalorder %s1970_s2, %s2367_s26 }
 0x397   : > { %v2267_v31 = vpop.f32.mrf.mxu1  ;;  %p2363_p12 = scmp.ne.s32.totalorder %s1970_s2, %s2362_s18  ;;  %p2370_p2 = scmp.lt.s32.totalorder %s2368_s27, %s2362_s18 }
 0x398   : > { %1583 = vrot.lane.b32.xlu1 %v1581_v30, %s2447_s30  ;;  %v1806_v30 = vld [vmem:[%s2955_s13 + $0x8] sm:$0xff]  ;;  %v1821_v31 = vld [vmem:[%s2955_s13 + $0x80] sm:$0xff] }
 0x399   : > { %p2364_p13 = pnand %p2363_p12, %p2579_p4  ;;  %p2371_p3 = por %p2370_p2, %p2369_p1 }
 0x39b   : > { %p2365_p0 = pneg %p2364_p13 }
 0x39d   : > { %p2372_p5 = pnand %p2371_p3, %p2365_p0 }
 0x402   : > { %v1232_v32 = vpop.permute.xlu0 %1231 }
 0x403   : > { %1235 = vst.msk [vmem:[#allocation4] sm:$0xff] %vm1234_vm3, %v1232_v32  ;;  %v1805_v32 = vld [vmem:[%s2955_s13] sm:$0xff] }
 0x406   : > { %v1408_v33 = vpop.permute.xlu1 %1407 }
 0x407   : > { %1411 = vst.msk [vmem:[#allocation4] sm:$0xff] %vm1410_vm4, %v1408_v33  ;;  %v1717_v33 = vlaneseq }
 0x40a   : > { %v1584_v34 = vpop.permute.xlu1 %1583 }
 0x40b   : > { %1587 = vst.msk [vmem:[#allocation4] sm:$0xff] %vm1586_vm5, %v1584_v34  ;;  %v1718_v34 = vshrl.u32 %v1717_v33, 7 }
 0x412   : > { %v1588_v1 = vld [vmem:[#allocation4] sm:$0xff] }
 0x413   : > { %2277 = vmatmul.mubr.msk.f32.vlgmr.msra.gmra.mxu0 %vm646_vm1, %v1588_v1  ;;  %v1719_v1 = vsub.s32 0, %v1718_v34 }
 0x414   : > { %2161 = vmatpush3.msra.mxu0 %v1820_v54 }
 0x415   : > { %2162 = vmatprep.subr.mxu0 %v1835_v55 }
 0x416   : > { %2163 = vmatpush3.msra.mxu0 %v1819_v56 }
 0x417   : > { %2164 = vmatprep.subr.mxu0 %v1834_v57 }
 0x418   : > { %2165 = vmatpush3.msra.mxu0 %v1818_v58 }
 0x419   : > { %2166 = vmatprep.subr.mxu0 %v1833_v59 }
 0x41a   : > { %2167 = vmatpush3.msra.mxu0 %v1817_v60 }
 0x41b   : > { %2168 = vmatprep.subr.mxu0 %v1832_v61 }
 0x41c   : > { %2169 = vmatpush3.msra.mxu0 %v1816_v62 }
 0x41d   : > { %2170 = vmatprep.subr.mxu0 %v1831_v63  ;;  %v2118_v63 = vld [vmem:[%s2957_s15] ss:$0 sm:$0xff] }
 0x41e   : > { %2171 = vmatpush3.msra.mxu0 %v1815_v0 }
 0x41f   : > { %2172 = vmatprep.subr.mxu0 %v1830_v2  ;;  %v2119_v2 = vld [vmem:[%s2958_s16] ss:$0 sm:$0xff] }
 0x420   : > { %2173 = vmatpush3.msra.mxu0 %v1814_v3 }
 0x421   : > { %2174 = vmatprep.subr.mxu0 %v1829_v4 }
 0x422   : > { %2175 = vmatpush3.msra.mxu0 %v1813_v6 }
 0x423   : > { %2176 = vmatprep.subr.mxu0 %v1828_v7 }
 0x424   : > { %2177 = vmatpush3.msra.mxu0 %v1812_v8 }
 0x425   : > { %2178 = vmatprep.subr.mxu0 %v1827_v9 }
 0x426   : > { %2179 = vmatpush3.msra.mxu0 %v1811_v10 }
 0x427   : > { %2180 = vmatprep.subr.mxu0 %v1826_v11 }
 0x428   : > { %2181 = vmatpush3.msra.mxu0 %v1810_v12 }
 0x429   : > { %2182 = vmatprep.subr.mxu0 %v1825_v13 }
 0x42a   : > { %2183 = vmatpush3.msra.mxu0 %v1809_v14 }
 0x42b   : > { %2184 = vmatprep.subr.mxu0 %v1824_v25 }
 0x42c   : > { %2185 = vmatpush3.msra.mxu0 %v1808_v26 }
 0x42d   : > { %2186 = vmatprep.subr.mxu0 %v1823_v27 }
 0x42e   : > { %2187 = vmatpush3.msra.mxu0 %v1807_v28 }
 0x42f   : > { %2188 = vmatprep.subr.mxu0 %v1822_v29 }
 0x430   : > { %2189 = vmatpush3.msra.mxu0 %v1806_v30 }
 0x431   : > { %2190 = vmatprep.subr.mxu0 %v1821_v31 }
 0x432   : > { %2191 = vmatpush3.msra.mxu0 %v1805_v32 }
 0x4d3   : > { %v1669_v36 = vpop.f32.mrf.mxu0 }
 0x4d4   : > { %v1670_v37 = vadd.f32 %v2112_v35, %v1669_v36  ;;  %v1715_v35 = vld [vmem:[%s2954_s12] sm:$0x3]  ;;  %v1723_v36 = vsub.s32 1, %v1718_v34 }
 0x4d5   : > { %v2278_v38 = vpop.f32.mrf.mxu0 }
 0x4d6   : > { %v1673_v39 = vadd.f32 %v1670_v37, %v2621_v5  ;;  %v1713_v5 = vld [vmem:[%s2953_s11 + $0x30] sm:$0xff]  ;;  %v1720_v37 = vrot.slane %v1715_v35, %v1719_v1  ;;  %v1724_v38 = vrot.slane %v1715_v35, %v1723_v36 }
 0x4d7   : > { %1756 = vmatpush1.msra.mxu1 %v1713_v5 }
 0x4d8   : > { %v1676_v40 = vsel %vm646_vm1, %v1673_v39, 0.0  ;;  %1757 = vmatprep.subr.mxu1 %v1712_v47 }
 0x4d9   : > { %1677 = vadd.xlane.f32.xlu0 %v1676_v40  ;;  %1758 = vmatpush1.msra.mxu1 %v1711_v48 }
 0x4da   : > { %1759 = vmatprep.subr.mxu1 %v1710_v49  ;;  %v2117_v49 = vld [vmem:[%s2956_s14] ss:$0 sm:$0xff] }
 0x4db   : > { %1760 = vmatpush1.msra.mxu1 %v1709_v50 }
 0x4dc   : > { %1761 = vmatprep.subr.mxu1 %v1708_v51 }
 0x4dd   : > { %1762 = vmatpush1.msra.mxu1 %v1707_v52 }
 0x562   : > { %v1678_v41 = vpop.xlane.xlu0 %1677 }
 0x563   : > { %v1680_v42 = vmul.f32 0.03125, %v1678_v41 }
 0x565   : > { %v2753_v43 = vsub.f32 %v1673_v39, %v1680_v42 }
 0x567   : > { %v1682_v44 = vmul.f32 %v2753_v43, %v2753_v43 }
 0x569   : > { %v1683_v45 = vsel %vm646_vm1, %v1682_v44, 0.0 }
 0x56a   : > { %1684 = vadd.xlane.f32.xlu1 %v1683_v45 }
 0x5f3   : > { %v1685_v15 = vpop.xlane.xlu1 %1684 }
 0x5f4   : > { %v1686_v16 = vmul.f32 0.03125, %v1685_v15 }
 0x5f6   : > { %v1687_v17 = vadd.f32 1e-05, %v1686_v16 }
 0x5f8   : > { %2358 = vrsqrt.f32 %v1687_v17 }
 0x605   : > { %v2359_v18 = vpop.eup %2358 }
 0x606   : > { %v1689_v20 = vmul.f32 %v2359_v18, %v2753_v43 }
 0x608   : > { %v1696_v22 = vmul.f32 %v2114_v19, %v1689_v20 }
 0x60a   : > { %v1703_v23 = vadd.f32 %v2115_v21, %v1696_v22 }
 0x60c   : > { %1704 = vst.msk [vmem:[#allocation5] sm:$0xff] %vm646_vm1, %v1703_v23 }
 0x613   : > { %v1706_v24 = vld [vmem:[#allocation5] sm:$0xff] }
 0x614   : > { %2116 = vmatmul.mubr.msk.f32.vlgmr.msra.gmra.mxu1 %vm646_vm1, %v1706_v24 }
 0x6d4   : > { %v1797_v39 = vpop.f32.mrf.mxu1 }
 0x6d5   : > { %v1798_v40 = vadd.f32 %v1797_v39, %v1720_v37 }
 0x6d6   : > { %v1799_v41 = vpop.f32.mrf.mxu1 }
 0x6d7   : > { %v1800_v42 = vadd.f32 %v1799_v41, %v1724_v38  ;;  %v1802_v44 = vmax.f32 %v1798_v40, 0.0 }
 0x6d9   : > { %v1803_v43 = vmax.f32 %v1800_v42, 0.0 }
 0x6db   : > { %1901 = vmatprep.mubr.f32.mxu0 %v1803_v43 }
 0x6dc   : > { %1902 = vmatmul.mubr.f32.vlgmr.msra.gmra.mxu0 %v1802_v44 }
 0x79c   : > { %v2192_v45 = vpop.f32.mrf.mxu0 }
 0x79e   : > { %v2193_v5 = vpop.f32.mrf.mxu0 }
 0x79f   : > { %v2194_v47 = vadd.f32 %v2193_v5, %v2192_v45 }
 0x7a1   : > { %v1907_v48 = vadd.f32 %v2194_v47, %v1804_v46 }
 0x7a3   : > { %1908 = vst.msk [vmem:[#allocation6] sm:$0xff] %vm646_vm1, %v1907_v48 }
 0x7aa   : > { %v1912_v50 = vld [vmem:[#allocation6] sm:$0xff] }
 0x7ab   : > { %v1920_v51 = vadd.f32 %v2117_v49, %v1912_v50 }
 0x7ad   : > { %v1922_v52 = vadd.f32 %v1920_v51, %v1706_v24 }
 0x7af   : > { %v1925_v53 = vsel %vm646_vm1, %v1922_v52, 0.0 }
 0x7b0   : > { %1926 = vadd.xlane.f32.xlu0 %v1925_v53 }
 0x839   : > { %v1927_v54 = vpop.xlane.xlu0 %1926 }
 0x83a   : > { %v1929_v55 = vmul.f32 0.03125, %v1927_v54 }
 0x83c   : > { %v1930_v56 = vsub.f32 %v1922_v52, %v1929_v55 }
 0x83e   : > { %v1931_v57 = vmul.f32 %v1930_v56, %v1930_v56 }
 0x840   : > { %v1932_v58 = vsel %vm646_vm1, %v1931_v57, 0.0 }
 0x841   : > { %1933 = vadd.xlane.f32.xlu0 %v1932_v58 }
 0x8ca   : > { %v1934_v59 = vpop.xlane.xlu0 %1933 }
 0x8cb   : > { %v1935_v60 = vmul.f32 0.03125, %v1934_v59 }
 0x8cd   : > { %v1936_v61 = vadd.f32 1e-05, %v1935_v60 }
 0x8cf   : > { %2360 = vrsqrt.f32 %v1936_v61 }
 0x8dc   : > { %v2361_v62 = vpop.eup %2360 }
 0x8dd   : > { %v1938_v0 = vmul.f32 %v2361_v62, %v1930_v56 }
 0x8df   : > { %v1945_v3 = vmul.f32 %v2118_v63, %v1938_v0 }
 0x8e1   : > { %v1952_v4 = vadd.f32 %v2119_v2, %v1945_v3 }
 0x8e3   : > { %1953 = vst.msk [vmem:[%s606_s22] sm:$0xff] %vm646_vm1, %v1952_v4 }
 0x8e4   : > { %2375 = shalt.err (!%p2372_p5)
}
 0x8e5   : > { %s2376_s3 = scalar_lea.hbm %s1967_s4, 128  ;;  %s2380_s28 = scalar_lea.hbm %s2959_s17, 256 }
 0x8e6   : > { %p2377_p6 = scmp.ne.s32.totalorder %s1967_s4, %s2376_s3  ;;  %p2381_p10 = scmp.lt.s32.totalorder %s1967_s4, %s2959_s17 }
 0x8e7   : > { %p2382_p11 = scmp.lt.s32.totalorder %s2380_s28, %s2376_s3 }
 0x8e8   : > { %p2378_p7 = pnand %p2377_p6, %p2579_p4 }
 0x8e9   : > { %p2383_p12 = por %p2382_p11, %p2381_p10 }
 0x8ea   : > { %p2379_p9 = pneg %p2378_p7 }
 0x8ec   : > { %p2384_p13 = pnand %p2383_p12, %p2379_p9 }
 0x8ee   : > { %2387 = shalt.err (!%p2384_p13)
}
 0x8ef   : > { %2279 = dma.vmem_to_hbm [thread:$0]  (%p2579_p4), %s1970_s2, 128, %s1967_s4, %s1955_s5  }
 0x8f0 PF: > { %p2285_p0 = scmp.ge.s32.totalorder %s2438_s29, 2  ;;  %s1981_s18 = sand.u32 1, %s2418_s24  }
 0x8f1   : > { %s1982_s19 = scalar_lea.sflag [#allocation8], %s1981_s18 }
 0x8f2   : > { %p2282_p1 = pnand %p2285_p0, %p2586_p8 }
 0x8f4   : > { %p2283_p2 = pneg %p2282_p1 }
 0x8f6   : > { %2413 = dma.done.wait (%p2283_p2), %s1982_s19, 128  }
 0x8f7   : > { %2415 = vsyncadd (%p2283_p2), %s1982_s19, 4294967168  ;;  %s30_s29 = sadd.s32 1, %s2438_s29   ;;  %s2985_s26 = sld [smem:[#allocation10_spill]] }
 0x8f8   : > { %p27_p3 = scmp.ge.s32.totalorder %s30_s29, 4   ;;  %s2986_s27 = sld [smem:[#allocation14_spill]] }
 0x8f9   : > { %s2987_s1 = sld [smem:[#allocation11_spill]]  ;;  %s2989_s24 = smov %s2422_s25 }
 0x8fa   : > { %s2988_s28 = sld [smem:[#allocation12_spill]] }
 0x8fb   :  { %29 = sbr.rel (!%p27_p3) target bundleno = 11 (0xb), region = 145 }
 0x8fd   : > { %s2990_s25 = smov %s2985_s26 }
 0x8fe   : > { %s2991_s26 = smov %s2986_s27 }
 0x8ff   : > { %s2992_s27 = smov %s2987_s1 }
 0x900   :  { %1987 = vsyncpa [#allocation8], 1 }
 0x901   :  { %1989 = vsyncpa [#allocation8 + $0x1], 1 }

</bundles_post_ra>
